<compile_context>
chip_gen: v6e
topology: v6e:2x2x1
jax: 0.10.0
libtpu: 0.0.40
codegen_flags: <defaults>
</compile_context>

<pallas_src>
import jax
import jax.numpy as jnp
from jax.experimental import pallas as pl
from jax.experimental.pallas import tpu as pltpu


# ----------------------------------------------------------------------------
# Fused kernel: stacked LSTM (time recurrence inside) + ReLU/FC/ReLU/FC head.
# ----------------------------------------------------------------------------
def _fused_lstm_mlp_kernel(x_ref, *rest):
    """x_ref: (T, B, D) time-major.

    rest = [wih_t, whh_t, b] * num_layers, w1_t, b1, w2_t_pad, b2_pad, out_ref
    """
    num_layers = (len(rest) - 5) // 3
    layer_refs = [tuple(rest[3 * l: 3 * l + 3]) for l in range(num_layers)]
    w1_ref, b1_ref, w2_ref, b2_ref, out_ref = rest[3 * num_layers:]

    T, B, D = x_ref.shape
    H = layer_refs[0][1].shape[0]            # whh_t: (H, 4H)

    # ---- hoisted layer-0 input projection: ONE (T*B, D) x (D, 4H) matmul ----
    # x is time-major, so row t*B + b of gx0 is the step-t gate input: per-step
    # reads below are contiguous static slices of this register-resident value.
    gx0 = (jnp.dot(x_ref[...].reshape(T * B, D), layer_refs[0][0][...],
                   preferred_element_type=jnp.float32)
           + layer_refs[0][2][...])                      # (T*B, 4H)

    # Loop-invariant weights as values (loaded from VMEM once).
    whh = [layer_refs[l][1][...] for l in range(num_layers)]       # (H, 4H)
    wih_up = [layer_refs[l][0][...] for l in range(1, num_layers)]  # (H, 4H)
    b_up = [layer_refs[l][2][...] for l in range(1, num_layers)]    # (1, 4H)

    h = [jnp.zeros((B, H), jnp.float32) for _ in range(num_layers)]
    c = [jnp.zeros((B, H), jnp.float32) for _ in range(num_layers)]

    def lstm_cell(gates, c_prev):
        # One sigmoid over the full (B, 4H) vreg + one tanh on the g slice
        # (2 EUP pushes/step instead of 4, half the pre-activation slicing).
        s = jax.nn.sigmoid(gates)
        i_g = s[:, 0 * H:1 * H]
        f_g = s[:, 1 * H:2 * H]
        o_g = s[:, 3 * H:4 * H]
        g_g = jnp.tanh(gates[:, 2 * H:3 * H])
        c_new = f_g * c_prev + i_g * g_g
        h_new = o_g * jnp.tanh(c_new)
        return h_new, c_new

    # Serial recurrence; T is small & static -> fully unrolled.  Layers >= 1
    # consume h_{l-1, t} directly from registers (no inter-layer hidden-sequence
    # buffer), so their dependency chains interleave with layer l-1's next steps.
    for t in range(T):
        gates0 = gx0[t * B:(t + 1) * B, :] + jnp.dot(
            h[0], whh[0], preferred_element_type=jnp.float32)
        h[0], c[0] = lstm_cell(gates0, c[0])
        for l in range(1, num_layers):
            gates = (jnp.dot(h[l - 1], wih_up[l - 1],
                             preferred_element_type=jnp.float32)
                     + jnp.dot(h[l], whh[l],
                               preferred_element_type=jnp.float32)
                     + b_up[l - 1])
            h[l], c[l] = lstm_cell(gates, c[l])

    # ---- fused MLP head: relu(hn) -> fc1 -> relu -> fc2 (lane-padded) ----
    # hn stacked as (num_layers*B, H) reproduces PyTorch's hn.view(-1, H) ordering;
    # one pass through the head, one lane-dense store.
    hn = jnp.concatenate(h, axis=0)
    z = jnp.maximum(hn, 0.0)
    z = jnp.maximum(
        jnp.dot(z, w1_ref[...], preferred_element_type=jnp.float32) + b1_ref[...],
        0.0)
    o = jnp.dot(z, w2_ref[...], preferred_element_type=jnp.float32) + b2_ref[...]
    out_ref[...] = o.astype(out_ref.dtype)


# ----------------------------------------------------------------------------
# Wrapper: single pallas_call, everything resident in VMEM.
# ----------------------------------------------------------------------------
def lstm_module_forward(x, params):
    """x: (B, T, input_size) batch_first, matching the PyTorch module."""
    B, T, _ = x.shape
    layers = params["lstm_layers"]
    num_layers = len(layers)
    num_classes = params["num_classes"]
    c_pad = params["w2_t_pad"].shape[1]

    # Time-major layout for the kernel (one tiny XLA transpose outside the kernel);
    # makes the hoisted projection's per-step rows contiguous.
    x_tm = jnp.transpose(x, (1, 0, 2))                   # (T, B, D)

    args = [x_tm]
    for lp in layers:
        args += [lp["wih_t"], lp["whh_t"], lp["b"]]
    args += [params["w1_t"], params["b1"], params["w2_t_pad"], params["b2_pad"]]

    vmem = pl.BlockSpec(memory_space=pltpu.MemorySpace.VMEM)
    out_pad = pl.pallas_call(
        _fused_lstm_mlp_kernel,
        out_shape=jax.ShapeDtypeStruct((num_layers * B, c_pad), jnp.float32),
        in_specs=[vmem] * len(args),
        out_specs=vmem,
    )(*args)
    return out_pad[:, :num_classes]                      # drop lane padding


# ----------------------------------------------------------------------------
# Parameter construction (PyTorch-style init, weights pre-transposed for MXU).
# ----------------------------------------------------------------------------
def init_params(key, input_size, hidden_size, num_layers, num_classes,
                fc1=128, lane_pad=128):
    ks = jax.random.split(key, 4 * num_layers + 4)
    k = 1.0 / jnp.sqrt(hidden_size)
    layers = []
    for l in range(num_layers):
        d_in = input_size if l == 0 else hidden_size
        wih = jax.random.uniform(ks[4 * l + 0], (4 * hidden_size, d_in),
                                 minval=-k, maxval=k, dtype=jnp.float32)
        whh = jax.random.uniform(ks[4 * l + 1], (4 * hidden_size, hidden_size),
                                 minval=-k, maxval=k, dtype=jnp.float32)
        bih = jax.random.uniform(ks[4 * l + 2], (4 * hidden_size,),
                                 minval=-k, maxval=k, dtype=jnp.float32)
        bhh = jax.random.uniform(ks[4 * l + 3], (4 * hidden_size,),
                                 minval=-k, maxval=k, dtype=jnp.float32)
        layers.append({
            "wih_t": wih.T,                       # (d_in, 4H)
            "whh_t": whh.T,                       # (H, 4H)
            "b": (bih + bhh).reshape(1, -1),      # (1, 4H)
        })
    kf = 1.0 / jnp.sqrt(hidden_size)
    w1 = jax.random.uniform(ks[-4], (fc1, hidden_size), minval=-kf, maxval=kf,
                            dtype=jnp.float32)
    b1 = jax.random.uniform(ks[-3], (fc1,), minval=-kf, maxval=kf,
                            dtype=jnp.float32)
    kf2 = 1.0 / jnp.sqrt(fc1)
    w2 = jax.random.uniform(ks[-2], (num_classes, fc1), minval=-kf2, maxval=kf2,
                            dtype=jnp.float32)
    b2 = jax.random.uniform(ks[-1], (num_classes,), minval=-kf2, maxval=kf2,
                            dtype=jnp.float32)

    # Zero-pad fc_2 to a lane-dense (128-wide) output; wrapper slices back to C.
    c_pad = ((num_classes + lane_pad - 1) // lane_pad) * lane_pad
    w2_t = w2.T                                            # (fc1, C)
    w2_t_pad = jnp.zeros((fc1, c_pad), jnp.float32).at[:, :num_classes].set(w2_t)
    b2_pad = jnp.zeros((1, c_pad), jnp.float32).at[:, :num_classes].set(
        b2.reshape(1, -1))

    return {
        "lstm_layers": layers,
        "w1_t": w1.T, "b1": b1.reshape(1, -1),
        "w2_t": w2_t, "b2": b2.reshape(1, -1),
        "w2_t_pad": w2_t_pad, "b2_pad": b2_pad,
        "num_classes": num_classes,
    }


# ----------------------------------------------------------------------------
# Pure-JAX reference (for correctness check).
# ----------------------------------------------------------------------------
def reference_forward(x, params, hidden_size):
    B, T, _ = x.shape
    layer_in = x
    hn_list = []
    for lp in params["lstm_layers"]:
        h = jnp.zeros((B, hidden_size), jnp.float32)
        c = jnp.zeros((B, hidden_size), jnp.float32)
        hs = []
        for t in range(T):
            g = layer_in[:, t, :] @ lp["wih_t"] + h @ lp["whh_t"] + lp["b"]
            H = hidden_size
            i = jax.nn.sigmoid(g[:, :H])
            f = jax.nn.sigmoid(g[:, H:2 * H])
            gg = jnp.tanh(g[:, 2 * H:3 * H])
            o = jax.nn.sigmoid(g[:, 3 * H:])
            c = f * c + i * gg
            h = o * jnp.tanh(c)
            hs.append(h)
        layer_in = jnp.stack(hs, axis=1)
        hn_list.append(h)
    hn_flat = jnp.concatenate(hn_list, axis=0)
    out = jnp.maximum(hn_flat, 0.0)
    out = jnp.maximum(out @ params["w1_t"] + params["b1"], 0.0)
    return out @ params["w2_t"] + params["b2"]


if __name__ == "__main__":
    num_classes, input_size, hidden_size, num_layers = 5, 16, 32, 2
    batch, seq = 2, 8

    key = jax.random.PRNGKey(0)
    kx, kp = jax.random.split(key)
    x = jax.random.normal(kx, (batch, seq, input_size), dtype=jnp.float32)
    params = init_params(kp, input_size, hidden_size, num_layers, num_classes)

    out = lstm_module_forward(x, params)
    out = jax.block_until_ready(out)

    ref = reference_forward(x, params, hidden_size)
    assert out.shape == (num_layers * batch, num_classes), out.shape
    assert jnp.allclose(out, ref, atol=1e-4, rtol=1e-4), \
        float(jnp.max(jnp.abs(out - ref)))

    print("KERNEL_OK")
</pallas_src>

<mosaic_0001>
module attributes {stable_mosaic.version = 11 : i64} {
  func.func @_fused_lstm_mlp_kernel(%arg0: memref<8x2x16xf32, #tpu.memory_space<vmem>>, %arg1: memref<16x128xf32, #tpu.memory_space<vmem>>, %arg2: memref<32x128xf32, #tpu.memory_space<vmem>>, %arg3: memref<1x128xf32, #tpu.memory_space<vmem>>, %arg4: memref<32x128xf32, #tpu.memory_space<vmem>>, %arg5: memref<32x128xf32, #tpu.memory_space<vmem>>, %arg6: memref<1x128xf32, #tpu.memory_space<vmem>>, %arg7: memref<32x128xf32, #tpu.memory_space<vmem>>, %arg8: memref<1x128xf32, #tpu.memory_space<vmem>>, %arg9: memref<128x128xf32, #tpu.memory_space<vmem>>, %arg10: memref<1x128xf32, #tpu.memory_space<vmem>>, %arg11: memref<4x128xf32, #tpu.memory_space<vmem>>) attributes {dimension_semantics = [], scalar_prefetch = 0 : i64, scratch_operands = 0 : i64, tpu.core_type = #tpu.core_type<tc>} {
    %c0 = arith.constant 0 : index
    %c0_0 = arith.constant 0 : index
    %c0_1 = arith.constant 0 : index
    %0 = vector.load %arg0[%c0, %c0_0, %c0_1] : memref<8x2x16xf32, #tpu.memory_space<vmem>>, vector<8x2x16xf32>
    %1 = vector.shape_cast %0 : vector<8x2x16xf32> to vector<16x16xf32>
    %c0_2 = arith.constant 0 : index
    %c0_3 = arith.constant 0 : index
    %2 = vector.load %arg1[%c0_2, %c0_3] : memref<16x128xf32, #tpu.memory_space<vmem>>, vector<16x128xf32>
    %cst = arith.constant dense<0.000000e+00> : vector<16x128xf32>
    %3 = tpu.matmul %1, %2, %cst {dimension_numbers = #tpu.dot_dimension_numbers<[1], [0], [0], [1], [0, 0, 1, 1], [], []>} : vector<16x16xf32>, vector<16x128xf32>, vector<16x128xf32> -> vector<16x128xf32>
    %c0_4 = arith.constant 0 : index
    %c0_5 = arith.constant 0 : index
    %4 = vector.load %arg3[%c0_4, %c0_5] : memref<1x128xf32, #tpu.memory_space<vmem>>, vector<1x128xf32>
    %5 = vector.broadcast %4 : vector<1x128xf32> to vector<16x128xf32>
    %6 = arith.addf %3, %5 : vector<16x128xf32>
    %c0_6 = arith.constant 0 : index
    %c0_7 = arith.constant 0 : index
    %7 = vector.load %arg2[%c0_6, %c0_7] : memref<32x128xf32, #tpu.memory_space<vmem>>, vector<32x128xf32>
    %c0_8 = arith.constant 0 : index
    %c0_9 = arith.constant 0 : index
    %8 = vector.load %arg5[%c0_8, %c0_9] : memref<32x128xf32, #tpu.memory_space<vmem>>, vector<32x128xf32>
    %c0_10 = arith.constant 0 : index
    %c0_11 = arith.constant 0 : index
    %9 = vector.load %arg4[%c0_10, %c0_11] : memref<32x128xf32, #tpu.memory_space<vmem>>, vector<32x128xf32>
    %c0_12 = arith.constant 0 : index
    %c0_13 = arith.constant 0 : index
    %10 = vector.load %arg6[%c0_12, %c0_13] : memref<1x128xf32, #tpu.memory_space<vmem>>, vector<1x128xf32>
    %cst_14 = arith.constant 0.000000e+00 : f32
    %11 = vector.broadcast %cst_14 : f32 to vector<2x32xf32>
    %cst_15 = arith.constant 0.000000e+00 : f32
    %12 = vector.broadcast %cst_15 : f32 to vector<2x32xf32>
    %cst_16 = arith.constant 0.000000e+00 : f32
    %13 = vector.broadcast %cst_16 : f32 to vector<2x32xf32>
    %cst_17 = arith.constant 0.000000e+00 : f32
    %14 = vector.broadcast %cst_17 : f32 to vector<2x32xf32>
    %15 = vector.extract_strided_slice %6 {offsets = [0, 0], sizes = [2, 128], strides = [1, 1]} : vector<16x128xf32> to vector<2x128xf32>
    %cst_18 = arith.constant dense<0.000000e+00> : vector<2x128xf32>
    %16 = tpu.matmul %11, %7, %cst_18 {dimension_numbers = #tpu.dot_dimension_numbers<[1], [0], [0], [1], [0, 0, 1, 1], [], []>} : vector<2x32xf32>, vector<32x128xf32>, vector<2x128xf32> -> vector<2x128xf32>
    %17 = arith.addf %15, %16 : vector<2x128xf32>
    %18 = arith.negf %17 : vector<2x128xf32>
    %19 = math.exp %18 : vector<2x128xf32>
    %cst_19 = arith.constant 1.000000e+00 : f32
    %20 = vector.broadcast %cst_19 : f32 to vector<2x128xf32>
    %21 = arith.addf %20, %19 : vector<2x128xf32>
    %22 = arith.divf %20, %21 : vector<2x128xf32>
    %23 = vector.extract_strided_slice %22 {offsets = [0, 0], sizes = [2, 32], strides = [1, 1]} : vector<2x128xf32> to vector<2x32xf32>
    %24 = vector.extract_strided_slice %22 {offsets = [0, 32], sizes = [2, 32], strides = [1, 1]} : vector<2x128xf32> to vector<2x32xf32>
    %25 = vector.extract_strided_slice %22 {offsets = [0, 96], sizes = [2, 32], strides = [1, 1]} : vector<2x128xf32> to vector<2x32xf32>
    %26 = vector.extract_strided_slice %17 {offsets = [0, 64], sizes = [2, 32], strides = [1, 1]} : vector<2x128xf32> to vector<2x32xf32>
    %27 = math.tanh %26 : vector<2x32xf32>
    %28 = arith.mulf %24, %13 : vector<2x32xf32>
    %29 = arith.mulf %23, %27 : vector<2x32xf32>
    %30 = arith.addf %28, %29 : vector<2x32xf32>
    %31 = math.tanh %30 : vector<2x32xf32>
    %32 = arith.mulf %25, %31 : vector<2x32xf32>
    %cst_20 = arith.constant dense<0.000000e+00> : vector<2x128xf32>
    %33 = tpu.matmul %32, %9, %cst_20 {dimension_numbers = #tpu.dot_dimension_numbers<[1], [0], [0], [1], [0, 0, 1, 1], [], []>} : vector<2x32xf32>, vector<32x128xf32>, vector<2x128xf32> -> vector<2x128xf32>
    %cst_21 = arith.constant dense<0.000000e+00> : vector<2x128xf32>
    %34 = tpu.matmul %12, %8, %cst_21 {dimension_numbers = #tpu.dot_dimension_numbers<[1], [0], [0], [1], [0, 0, 1, 1], [], []>} : vector<2x32xf32>, vector<32x128xf32>, vector<2x128xf32> -> vector<2x128xf32>
    %35 = arith.addf %33, %34 : vector<2x128xf32>
    %36 = vector.broadcast %10 : vector<1x128xf32> to vector<2x128xf32>
    %37 = arith.addf %35, %36 : vector<2x128xf32>
    %38 = arith.negf %37 : vector<2x128xf32>
    %39 = math.exp %38 : vector<2x128xf32>
    %cst_22 = arith.constant 1.000000e+00 : f32
    %40 = vector.broadcast %cst_22 : f32 to vector<2x128xf32>
    %41 = arith.addf %40, %39 : vector<2x128xf32>
    %42 = arith.divf %40, %41 : vector<2x128xf32>
    %43 = vector.extract_strided_slice %42 {offsets = [0, 0], sizes = [2, 32], strides = [1, 1]} : vector<2x128xf32> to vector<2x32xf32>
    %44 = vector.extract_strided_slice %42 {offsets = [0, 32], sizes = [2, 32], strides = [1, 1]} : vector<2x128xf32> to vector<2x32xf32>
    %45 = vector.extract_strided_slice %42 {offsets = [0, 96], sizes = [2, 32], strides = [1, 1]} : vector<2x128xf32> to vector<2x32xf32>
    %46 = vector.extract_strided_slice %37 {offsets = [0, 64], sizes = [2, 32], strides = [1, 1]} : vector<2x128xf32> to vector<2x32xf32>
    %47 = math.tanh %46 : vector<2x32xf32>
    %48 = arith.mulf %44, %14 : vector<2x32xf32>
    %49 = arith.mulf %43, %47 : vector<2x32xf32>
    %50 = arith.addf %48, %49 : vector<2x32xf32>
    %51 = math.tanh %50 : vector<2x32xf32>
    %52 = arith.mulf %45, %51 : vector<2x32xf32>
    %53 = vector.extract_strided_slice %6 {offsets = [2, 0], sizes = [2, 128], strides = [1, 1]} : vector<16x128xf32> to vector<2x128xf32>
    %cst_23 = arith.constant dense<0.000000e+00> : vector<2x128xf32>
    %54 = tpu.matmul %32, %7, %cst_23 {dimension_numbers = #tpu.dot_dimension_numbers<[1], [0], [0], [1], [0, 0, 1, 1], [], []>} : vector<2x32xf32>, vector<32x128xf32>, vector<2x128xf32> -> vector<2x128xf32>
    %55 = arith.addf %53, %54 : vector<2x128xf32>
    %56 = arith.negf %55 : vector<2x128xf32>
    %57 = math.exp %56 : vector<2x128xf32>
    %cst_24 = arith.constant 1.000000e+00 : f32
    %58 = vector.broadcast %cst_24 : f32 to vector<2x128xf32>
    %59 = arith.addf %58, %57 : vector<2x128xf32>
    %60 = arith.divf %58, %59 : vector<2x128xf32>
    %61 = vector.extract_strided_slice %60 {offsets = [0, 0], sizes = [2, 32], strides = [1, 1]} : vector<2x128xf32> to vector<2x32xf32>
    %62 = vector.extract_strided_slice %60 {offsets = [0, 32], sizes = [2, 32], strides = [1, 1]} : vector<2x128xf32> to vector<2x32xf32>
    %63 = vector.extract_strided_slice %60 {offsets = [0, 96], sizes = [2, 32], strides = [1, 1]} : vector<2x128xf32> to vector<2x32xf32>
    %64 = vector.extract_strided_slice %55 {offsets = [0, 64], sizes = [2, 32], strides = [1, 1]} : vector<2x128xf32> to vector<2x32xf32>
    %65 = math.tanh %64 : vector<2x32xf32>
    %66 = arith.mulf %62, %30 : vector<2x32xf32>
    %67 = arith.mulf %61, %65 : vector<2x32xf32>
    %68 = arith.addf %66, %67 : vector<2x32xf32>
    %69 = math.tanh %68 : vector<2x32xf32>
    %70 = arith.mulf %63, %69 : vector<2x32xf32>
    %cst_25 = arith.constant dense<0.000000e+00> : vector<2x128xf32>
    %71 = tpu.matmul %70, %9, %cst_25 {dimension_numbers = #tpu.dot_dimension_numbers<[1], [0], [0], [1], [0, 0, 1, 1], [], []>} : vector<2x32xf32>, vector<32x128xf32>, vector<2x128xf32> -> vector<2x128xf32>
    %cst_26 = arith.constant dense<0.000000e+00> : vector<2x128xf32>
    %72 = tpu.matmul %52, %8, %cst_26 {dimension_numbers = #tpu.dot_dimension_numbers<[1], [0], [0], [1], [0, 0, 1, 1], [], []>} : vector<2x32xf32>, vector<32x128xf32>, vector<2x128xf32> -> vector<2x128xf32>
    %73 = arith.addf %71, %72 : vector<2x128xf32>
    %74 = vector.broadcast %10 : vector<1x128xf32> to vector<2x128xf32>
    %75 = arith.addf %73, %74 : vector<2x128xf32>
    %76 = arith.negf %75 : vector<2x128xf32>
    %77 = math.exp %76 : vector<2x128xf32>
    %cst_27 = arith.constant 1.000000e+00 : f32
    %78 = vector.broadcast %cst_27 : f32 to vector<2x128xf32>
    %79 = arith.addf %78, %77 : vector<2x128xf32>
    %80 = arith.divf %78, %79 : vector<2x128xf32>
    %81 = vector.extract_strided_slice %80 {offsets = [0, 0], sizes = [2, 32], strides = [1, 1]} : vector<2x128xf32> to vector<2x32xf32>
    %82 = vector.extract_strided_slice %80 {offsets = [0, 32], sizes = [2, 32], strides = [1, 1]} : vector<2x128xf32> to vector<2x32xf32>
    %83 = vector.extract_strided_slice %80 {offsets = [0, 96], sizes = [2, 32], strides = [1, 1]} : vector<2x128xf32> to vector<2x32xf32>
    %84 = vector.extract_strided_slice %75 {offsets = [0, 64], sizes = [2, 32], strides = [1, 1]} : vector<2x128xf32> to vector<2x32xf32>
    %85 = math.tanh %84 : vector<2x32xf32>
    %86 = arith.mulf %82, %50 : vector<2x32xf32>
    %87 = arith.mulf %81, %85 : vector<2x32xf32>
    %88 = arith.addf %86, %87 : vector<2x32xf32>
    %89 = math.tanh %88 : vector<2x32xf32>
    %90 = arith.mulf %83, %89 : vector<2x32xf32>
    %91 = vector.extract_strided_slice %6 {offsets = [4, 0], sizes = [2, 128], strides = [1, 1]} : vector<16x128xf32> to vector<2x128xf32>
    %cst_28 = arith.constant dense<0.000000e+00> : vector<2x128xf32>
    %92 = tpu.matmul %70, %7, %cst_28 {dimension_numbers = #tpu.dot_dimension_numbers<[1], [0], [0], [1], [0, 0, 1, 1], [], []>} : vector<2x32xf32>, vector<32x128xf32>, vector<2x128xf32> -> vector<2x128xf32>
    %93 = arith.addf %91, %92 : vector<2x128xf32>
    %94 = arith.negf %93 : vector<2x128xf32>
    %95 = math.exp %94 : vector<2x128xf32>
    %cst_29 = arith.constant 1.000000e+00 : f32
    %96 = vector.broadcast %cst_29 : f32 to vector<2x128xf32>
    %97 = arith.addf %96, %95 : vector<2x128xf32>
    %98 = arith.divf %96, %97 : vector<2x128xf32>
    %99 = vector.extract_strided_slice %98 {offsets = [0, 0], sizes = [2, 32], strides = [1, 1]} : vector<2x128xf32> to vector<2x32xf32>
    %100 = vector.extract_strided_slice %98 {offsets = [0, 32], sizes = [2, 32], strides = [1, 1]} : vector<2x128xf32> to vector<2x32xf32>
    %101 = vector.extract_strided_slice %98 {offsets = [0, 96], sizes = [2, 32], strides = [1, 1]} : vector<2x128xf32> to vector<2x32xf32>
    %102 = vector.extract_strided_slice %93 {offsets = [0, 64], sizes = [2, 32], strides = [1, 1]} : vector<2x128xf32> to vector<2x32xf32>
    %103 = math.tanh %102 : vector<2x32xf32>
    %104 = arith.mulf %100, %68 : vector<2x32xf32>
    %105 = arith.mulf %99, %103 : vector<2x32xf32>
    %106 = arith.addf %104, %105 : vector<2x32xf32>
    %107 = math.tanh %106 : vector<2x32xf32>
    %108 = arith.mulf %101, %107 : vector<2x32xf32>
    %cst_30 = arith.constant dense<0.000000e+00> : vector<2x128xf32>
    %109 = tpu.matmul %108, %9, %cst_30 {dimension_numbers = #tpu.dot_dimension_numbers<[1], [0], [0], [1], [0, 0, 1, 1], [], []>} : vector<2x32xf32>, vector<32x128xf32>, vector<2x128xf32> -> vector<2x128xf32>
    %cst_31 = arith.constant dense<0.000000e+00> : vector<2x128xf32>
    %110 = tpu.matmul %90, %8, %cst_31 {dimension_numbers = #tpu.dot_dimension_numbers<[1], [0], [0], [1], [0, 0, 1, 1], [], []>} : vector<2x32xf32>, vector<32x128xf32>, vector<2x128xf32> -> vector<2x128xf32>
    %111 = arith.addf %109, %110 : vector<2x128xf32>
    %112 = vector.broadcast %10 : vector<1x128xf32> to vector<2x128xf32>
    %113 = arith.addf %111, %112 : vector<2x128xf32>
    %114 = arith.negf %113 : vector<2x128xf32>
    %115 = math.exp %114 : vector<2x128xf32>
    %cst_32 = arith.constant 1.000000e+00 : f32
    %116 = vector.broadcast %cst_32 : f32 to vector<2x128xf32>
    %117 = arith.addf %116, %115 : vector<2x128xf32>
    %118 = arith.divf %116, %117 : vector<2x128xf32>
    %119 = vector.extract_strided_slice %118 {offsets = [0, 0], sizes = [2, 32], strides = [1, 1]} : vector<2x128xf32> to vector<2x32xf32>
    %120 = vector.extract_strided_slice %118 {offsets = [0, 32], sizes = [2, 32], strides = [1, 1]} : vector<2x128xf32> to vector<2x32xf32>
    %121 = vector.extract_strided_slice %118 {offsets = [0, 96], sizes = [2, 32], strides = [1, 1]} : vector<2x128xf32> to vector<2x32xf32>
    %122 = vector.extract_strided_slice %113 {offsets = [0, 64], sizes = [2, 32], strides = [1, 1]} : vector<2x128xf32> to vector<2x32xf32>
    %123 = math.tanh %122 : vector<2x32xf32>
    %124 = arith.mulf %120, %88 : vector<2x32xf32>
    %125 = arith.mulf %119, %123 : vector<2x32xf32>
    %126 = arith.addf %124, %125 : vector<2x32xf32>
    %127 = math.tanh %126 : vector<2x32xf32>
    %128 = arith.mulf %121, %127 : vector<2x32xf32>
    %129 = vector.extract_strided_slice %6 {offsets = [6, 0], sizes = [2, 128], strides = [1, 1]} : vector<16x128xf32> to vector<2x128xf32>
    %cst_33 = arith.constant dense<0.000000e+00> : vector<2x128xf32>
    %130 = tpu.matmul %108, %7, %cst_33 {dimension_numbers = #tpu.dot_dimension_numbers<[1], [0], [0], [1], [0, 0, 1, 1], [], []>} : vector<2x32xf32>, vector<32x128xf32>, vector<2x128xf32> -> vector<2x128xf32>
    %131 = arith.addf %129, %130 : vector<2x128xf32>
    %132 = arith.negf %131 : vector<2x128xf32>
    %133 = math.exp %132 : vector<2x128xf32>
    %cst_34 = arith.constant 1.000000e+00 : f32
    %134 = vector.broadcast %cst_34 : f32 to vector<2x128xf32>
    %135 = arith.addf %134, %133 : vector<2x128xf32>
    %136 = arith.divf %134, %135 : vector<2x128xf32>
    %137 = vector.extract_strided_slice %136 {offsets = [0, 0], sizes = [2, 32], strides = [1, 1]} : vector<2x128xf32> to vector<2x32xf32>
    %138 = vector.extract_strided_slice %136 {offsets = [0, 32], sizes = [2, 32], strides = [1, 1]} : vector<2x128xf32> to vector<2x32xf32>
    %139 = vector.extract_strided_slice %136 {offsets = [0, 96], sizes = [2, 32], strides = [1, 1]} : vector<2x128xf32> to vector<2x32xf32>
    %140 = vector.extract_strided_slice %131 {offsets = [0, 64], sizes = [2, 32], strides = [1, 1]} : vector<2x128xf32> to vector<2x32xf32>
    %141 = math.tanh %140 : vector<2x32xf32>
    %142 = arith.mulf %138, %106 : vector<2x32xf32>
    %143 = arith.mulf %137, %141 : vector<2x32xf32>
    %144 = arith.addf %142, %143 : vector<2x32xf32>
    %145 = math.tanh %144 : vector<2x32xf32>
    %146 = arith.mulf %139, %145 : vector<2x32xf32>
    %cst_35 = arith.constant dense<0.000000e+00> : vector<2x128xf32>
    %147 = tpu.matmul %146, %9, %cst_35 {dimension_numbers = #tpu.dot_dimension_numbers<[1], [0], [0], [1], [0, 0, 1, 1], [], []>} : vector<2x32xf32>, vector<32x128xf32>, vector<2x128xf32> -> vector<2x128xf32>
    %cst_36 = arith.constant dense<0.000000e+00> : vector<2x128xf32>
    %148 = tpu.matmul %128, %8, %cst_36 {dimension_numbers = #tpu.dot_dimension_numbers<[1], [0], [0], [1], [0, 0, 1, 1], [], []>} : vector<2x32xf32>, vector<32x128xf32>, vector<2x128xf32> -> vector<2x128xf32>
    %149 = arith.addf %147, %148 : vector<2x128xf32>
    %150 = vector.broadcast %10 : vector<1x128xf32> to vector<2x128xf32>
    %151 = arith.addf %149, %150 : vector<2x128xf32>
    %152 = arith.negf %151 : vector<2x128xf32>
    %153 = math.exp %152 : vector<2x128xf32>
    %cst_37 = arith.constant 1.000000e+00 : f32
    %154 = vector.broadcast %cst_37 : f32 to vector<2x128xf32>
    %155 = arith.addf %154, %153 : vector<2x128xf32>
    %156 = arith.divf %154, %155 : vector<2x128xf32>
    %157 = vector.extract_strided_slice %156 {offsets = [0, 0], sizes = [2, 32], strides = [1, 1]} : vector<2x128xf32> to vector<2x32xf32>
    %158 = vector.extract_strided_slice %156 {offsets = [0, 32], sizes = [2, 32], strides = [1, 1]} : vector<2x128xf32> to vector<2x32xf32>
    %159 = vector.extract_strided_slice %156 {offsets = [0, 96], sizes = [2, 32], strides = [1, 1]} : vector<2x128xf32> to vector<2x32xf32>
    %160 = vector.extract_strided_slice %151 {offsets = [0, 64], sizes = [2, 32], strides = [1, 1]} : vector<2x128xf32> to vector<2x32xf32>
    %161 = math.tanh %160 : vector<2x32xf32>
    %162 = arith.mulf %158, %126 : vector<2x32xf32>
    %163 = arith.mulf %157, %161 : vector<2x32xf32>
    %164 = arith.addf %162, %163 : vector<2x32xf32>
    %165 = math.tanh %164 : vector<2x32xf32>
    %166 = arith.mulf %159, %165 : vector<2x32xf32>
    %167 = vector.extract_strided_slice %6 {offsets = [8, 0], sizes = [2, 128], strides = [1, 1]} : vector<16x128xf32> to vector<2x128xf32>
    %cst_38 = arith.constant dense<0.000000e+00> : vector<2x128xf32>
    %168 = tpu.matmul %146, %7, %cst_38 {dimension_numbers = #tpu.dot_dimension_numbers<[1], [0], [0], [1], [0, 0, 1, 1], [], []>} : vector<2x32xf32>, vector<32x128xf32>, vector<2x128xf32> -> vector<2x128xf32>
    %169 = arith.addf %167, %168 : vector<2x128xf32>
    %170 = arith.negf %169 : vector<2x128xf32>
    %171 = math.exp %170 : vector<2x128xf32>
    %cst_39 = arith.constant 1.000000e+00 : f32
    %172 = vector.broadcast %cst_39 : f32 to vector<2x128xf32>
    %173 = arith.addf %172, %171 : vector<2x128xf32>
    %174 = arith.divf %172, %173 : vector<2x128xf32>
    %175 = vector.extract_strided_slice %174 {offsets = [0, 0], sizes = [2, 32], strides = [1, 1]} : vector<2x128xf32> to vector<2x32xf32>
    %176 = vector.extract_strided_slice %174 {offsets = [0, 32], sizes = [2, 32], strides = [1, 1]} : vector<2x128xf32> to vector<2x32xf32>
    %177 = vector.extract_strided_slice %174 {offsets = [0, 96], sizes = [2, 32], strides = [1, 1]} : vector<2x128xf32> to vector<2x32xf32>
    %178 = vector.extract_strided_slice %169 {offsets = [0, 64], sizes = [2, 32], strides = [1, 1]} : vector<2x128xf32> to vector<2x32xf32>
    %179 = math.tanh %178 : vector<2x32xf32>
    %180 = arith.mulf %176, %144 : vector<2x32xf32>
    %181 = arith.mulf %175, %179 : vector<2x32xf32>
    %182 = arith.addf %180, %181 : vector<2x32xf32>
    %183 = math.tanh %182 : vector<2x32xf32>
    %184 = arith.mulf %177, %183 : vector<2x32xf32>
    %cst_40 = arith.constant dense<0.000000e+00> : vector<2x128xf32>
    %185 = tpu.matmul %184, %9, %cst_40 {dimension_numbers = #tpu.dot_dimension_numbers<[1], [0], [0], [1], [0, 0, 1, 1], [], []>} : vector<2x32xf32>, vector<32x128xf32>, vector<2x128xf32> -> vector<2x128xf32>
    %cst_41 = arith.constant dense<0.000000e+00> : vector<2x128xf32>
    %186 = tpu.matmul %166, %8, %cst_41 {dimension_numbers = #tpu.dot_dimension_numbers<[1], [0], [0], [1], [0, 0, 1, 1], [], []>} : vector<2x32xf32>, vector<32x128xf32>, vector<2x128xf32> -> vector<2x128xf32>
    %187 = arith.addf %185, %186 : vector<2x128xf32>
    %188 = vector.broadcast %10 : vector<1x128xf32> to vector<2x128xf32>
    %189 = arith.addf %187, %188 : vector<2x128xf32>
    %190 = arith.negf %189 : vector<2x128xf32>
    %191 = math.exp %190 : vector<2x128xf32>
    %cst_42 = arith.constant 1.000000e+00 : f32
    %192 = vector.broadcast %cst_42 : f32 to vector<2x128xf32>
    %193 = arith.addf %192, %191 : vector<2x128xf32>
    %194 = arith.divf %192, %193 : vector<2x128xf32>
    %195 = vector.extract_strided_slice %194 {offsets = [0, 0], sizes = [2, 32], strides = [1, 1]} : vector<2x128xf32> to vector<2x32xf32>
    %196 = vector.extract_strided_slice %194 {offsets = [0, 32], sizes = [2, 32], strides = [1, 1]} : vector<2x128xf32> to vector<2x32xf32>
    %197 = vector.extract_strided_slice %194 {offsets = [0, 96], sizes = [2, 32], strides = [1, 1]} : vector<2x128xf32> to vector<2x32xf32>
    %198 = vector.extract_strided_slice %189 {offsets = [0, 64], sizes = [2, 32], strides = [1, 1]} : vector<2x128xf32> to vector<2x32xf32>
    %199 = math.tanh %198 : vector<2x32xf32>
    %200 = arith.mulf %196, %164 : vector<2x32xf32>
    %201 = arith.mulf %195, %199 : vector<2x32xf32>
    %202 = arith.addf %200, %201 : vector<2x32xf32>
    %203 = math.tanh %202 : vector<2x32xf32>
    %204 = arith.mulf %197, %203 : vector<2x32xf32>
    %205 = vector.extract_strided_slice %6 {offsets = [10, 0], sizes = [2, 128], strides = [1, 1]} : vector<16x128xf32> to vector<2x128xf32>
    %cst_43 = arith.constant dense<0.000000e+00> : vector<2x128xf32>
    %206 = tpu.matmul %184, %7, %cst_43 {dimension_numbers = #tpu.dot_dimension_numbers<[1], [0], [0], [1], [0, 0, 1, 1], [], []>} : vector<2x32xf32>, vector<32x128xf32>, vector<2x128xf32> -> vector<2x128xf32>
    %207 = arith.addf %205, %206 : vector<2x128xf32>
    %208 = arith.negf %207 : vector<2x128xf32>
    %209 = math.exp %208 : vector<2x128xf32>
    %cst_44 = arith.constant 1.000000e+00 : f32
    %210 = vector.broadcast %cst_44 : f32 to vector<2x128xf32>
    %211 = arith.addf %210, %209 : vector<2x128xf32>
    %212 = arith.divf %210, %211 : vector<2x128xf32>
    %213 = vector.extract_strided_slice %212 {offsets = [0, 0], sizes = [2, 32], strides = [1, 1]} : vector<2x128xf32> to vector<2x32xf32>
    %214 = vector.extract_strided_slice %212 {offsets = [0, 32], sizes = [2, 32], strides = [1, 1]} : vector<2x128xf32> to vector<2x32xf32>
    %215 = vector.extract_strided_slice %212 {offsets = [0, 96], sizes = [2, 32], strides = [1, 1]} : vector<2x128xf32> to vector<2x32xf32>
    %216 = vector.extract_strided_slice %207 {offsets = [0, 64], sizes = [2, 32], strides = [1, 1]} : vector<2x128xf32> to vector<2x32xf32>
    %217 = math.tanh %216 : vector<2x32xf32>
    %218 = arith.mulf %214, %182 : vector<2x32xf32>
    %219 = arith.mulf %213, %217 : vector<2x32xf32>
    %220 = arith.addf %218, %219 : vector<2x32xf32>
    %221 = math.tanh %220 : vector<2x32xf32>
    %222 = arith.mulf %215, %221 : vector<2x32xf32>
    %cst_45 = arith.constant dense<0.000000e+00> : vector<2x128xf32>
    %223 = tpu.matmul %222, %9, %cst_45 {dimension_numbers = #tpu.dot_dimension_numbers<[1], [0], [0], [1], [0, 0, 1, 1], [], []>} : vector<2x32xf32>, vector<32x128xf32>, vector<2x128xf32> -> vector<2x128xf32>
    %cst_46 = arith.constant dense<0.000000e+00> : vector<2x128xf32>
    %224 = tpu.matmul %204, %8, %cst_46 {dimension_numbers = #tpu.dot_dimension_numbers<[1], [0], [0], [1], [0, 0, 1, 1], [], []>} : vector<2x32xf32>, vector<32x128xf32>, vector<2x128xf32> -> vector<2x128xf32>
    %225 = arith.addf %223, %224 : vector<2x128xf32>
    %226 = vector.broadcast %10 : vector<1x128xf32> to vector<2x128xf32>
    %227 = arith.addf %225, %226 : vector<2x128xf32>
    %228 = arith.negf %227 : vector<2x128xf32>
    %229 = math.exp %228 : vector<2x128xf32>
    %cst_47 = arith.constant 1.000000e+00 : f32
    %230 = vector.broadcast %cst_47 : f32 to vector<2x128xf32>
    %231 = arith.addf %230, %229 : vector<2x128xf32>
    %232 = arith.divf %230, %231 : vector<2x128xf32>
    %233 = vector.extract_strided_slice %232 {offsets = [0, 0], sizes = [2, 32], strides = [1, 1]} : vector<2x128xf32> to vector<2x32xf32>
    %234 = vector.extract_strided_slice %232 {offsets = [0, 32], sizes = [2, 32], strides = [1, 1]} : vector<2x128xf32> to vector<2x32xf32>
    %235 = vector.extract_strided_slice %232 {offsets = [0, 96], sizes = [2, 32], strides = [1, 1]} : vector<2x128xf32> to vector<2x32xf32>
    %236 = vector.extract_strided_slice %227 {offsets = [0, 64], sizes = [2, 32], strides = [1, 1]} : vector<2x128xf32> to vector<2x32xf32>
    %237 = math.tanh %236 : vector<2x32xf32>
    %238 = arith.mulf %234, %202 : vector<2x32xf32>
    %239 = arith.mulf %233, %237 : vector<2x32xf32>
    %240 = arith.addf %238, %239 : vector<2x32xf32>
    %241 = math.tanh %240 : vector<2x32xf32>
    %242 = arith.mulf %235, %241 : vector<2x32xf32>
    %243 = vector.extract_strided_slice %6 {offsets = [12, 0], sizes = [2, 128], strides = [1, 1]} : vector<16x128xf32> to vector<2x128xf32>
    %cst_48 = arith.constant dense<0.000000e+00> : vector<2x128xf32>
    %244 = tpu.matmul %222, %7, %cst_48 {dimension_numbers = #tpu.dot_dimension_numbers<[1], [0], [0], [1], [0, 0, 1, 1], [], []>} : vector<2x32xf32>, vector<32x128xf32>, vector<2x128xf32> -> vector<2x128xf32>
    %245 = arith.addf %243, %244 : vector<2x128xf32>
    %246 = arith.negf %245 : vector<2x128xf32>
    %247 = math.exp %246 : vector<2x128xf32>
    %cst_49 = arith.constant 1.000000e+00 : f32
    %248 = vector.broadcast %cst_49 : f32 to vector<2x128xf32>
    %249 = arith.addf %248, %247 : vector<2x128xf32>
    %250 = arith.divf %248, %249 : vector<2x128xf32>
    %251 = vector.extract_strided_slice %250 {offsets = [0, 0], sizes = [2, 32], strides = [1, 1]} : vector<2x128xf32> to vector<2x32xf32>
    %252 = vector.extract_strided_slice %250 {offsets = [0, 32], sizes = [2, 32], strides = [1, 1]} : vector<2x128xf32> to vector<2x32xf32>
    %253 = vector.extract_strided_slice %250 {offsets = [0, 96], sizes = [2, 32], strides = [1, 1]} : vector<2x128xf32> to vector<2x32xf32>
    %254 = vector.extract_strided_slice %245 {offsets = [0, 64], sizes = [2, 32], strides = [1, 1]} : vector<2x128xf32> to vector<2x32xf32>
    %255 = math.tanh %254 : vector<2x32xf32>
    %256 = arith.mulf %252, %220 : vector<2x32xf32>
    %257 = arith.mulf %251, %255 : vector<2x32xf32>
    %258 = arith.addf %256, %257 : vector<2x32xf32>
    %259 = math.tanh %258 : vector<2x32xf32>
    %260 = arith.mulf %253, %259 : vector<2x32xf32>
    %cst_50 = arith.constant dense<0.000000e+00> : vector<2x128xf32>
    %261 = tpu.matmul %260, %9, %cst_50 {dimension_numbers = #tpu.dot_dimension_numbers<[1], [0], [0], [1], [0, 0, 1, 1], [], []>} : vector<2x32xf32>, vector<32x128xf32>, vector<2x128xf32> -> vector<2x128xf32>
    %cst_51 = arith.constant dense<0.000000e+00> : vector<2x128xf32>
    %262 = tpu.matmul %242, %8, %cst_51 {dimension_numbers = #tpu.dot_dimension_numbers<[1], [0], [0], [1], [0, 0, 1, 1], [], []>} : vector<2x32xf32>, vector<32x128xf32>, vector<2x128xf32> -> vector<2x128xf32>
    %263 = arith.addf %261, %262 : vector<2x128xf32>
    %264 = vector.broadcast %10 : vector<1x128xf32> to vector<2x128xf32>
    %265 = arith.addf %263, %264 : vector<2x128xf32>
    %266 = arith.negf %265 : vector<2x128xf32>
    %267 = math.exp %266 : vector<2x128xf32>
    %cst_52 = arith.constant 1.000000e+00 : f32
    %268 = vector.broadcast %cst_52 : f32 to vector<2x128xf32>
    %269 = arith.addf %268, %267 : vector<2x128xf32>
    %270 = arith.divf %268, %269 : vector<2x128xf32>
    %271 = vector.extract_strided_slice %270 {offsets = [0, 0], sizes = [2, 32], strides = [1, 1]} : vector<2x128xf32> to vector<2x32xf32>
    %272 = vector.extract_strided_slice %270 {offsets = [0, 32], sizes = [2, 32], strides = [1, 1]} : vector<2x128xf32> to vector<2x32xf32>
    %273 = vector.extract_strided_slice %270 {offsets = [0, 96], sizes = [2, 32], strides = [1, 1]} : vector<2x128xf32> to vector<2x32xf32>
    %274 = vector.extract_strided_slice %265 {offsets = [0, 64], sizes = [2, 32], strides = [1, 1]} : vector<2x128xf32> to vector<2x32xf32>
    %275 = math.tanh %274 : vector<2x32xf32>
    %276 = arith.mulf %272, %240 : vector<2x32xf32>
    %277 = arith.mulf %271, %275 : vector<2x32xf32>
    %278 = arith.addf %276, %277 : vector<2x32xf32>
    %279 = math.tanh %278 : vector<2x32xf32>
    %280 = arith.mulf %273, %279 : vector<2x32xf32>
    %281 = vector.extract_strided_slice %6 {offsets = [14, 0], sizes = [2, 128], strides = [1, 1]} : vector<16x128xf32> to vector<2x128xf32>
    %cst_53 = arith.constant dense<0.000000e+00> : vector<2x128xf32>
    %282 = tpu.matmul %260, %7, %cst_53 {dimension_numbers = #tpu.dot_dimension_numbers<[1], [0], [0], [1], [0, 0, 1, 1], [], []>} : vector<2x32xf32>, vector<32x128xf32>, vector<2x128xf32> -> vector<2x128xf32>
    %283 = arith.addf %281, %282 : vector<2x128xf32>
    %284 = arith.negf %283 : vector<2x128xf32>
    %285 = math.exp %284 : vector<2x128xf32>
    %cst_54 = arith.constant 1.000000e+00 : f32
    %286 = vector.broadcast %cst_54 : f32 to vector<2x128xf32>
    %287 = arith.addf %286, %285 : vector<2x128xf32>
    %288 = arith.divf %286, %287 : vector<2x128xf32>
    %289 = vector.extract_strided_slice %288 {offsets = [0, 0], sizes = [2, 32], strides = [1, 1]} : vector<2x128xf32> to vector<2x32xf32>
    %290 = vector.extract_strided_slice %288 {offsets = [0, 32], sizes = [2, 32], strides = [1, 1]} : vector<2x128xf32> to vector<2x32xf32>
    %291 = vector.extract_strided_slice %288 {offsets = [0, 96], sizes = [2, 32], strides = [1, 1]} : vector<2x128xf32> to vector<2x32xf32>
    %292 = vector.extract_strided_slice %283 {offsets = [0, 64], sizes = [2, 32], strides = [1, 1]} : vector<2x128xf32> to vector<2x32xf32>
    %293 = math.tanh %292 : vector<2x32xf32>
    %294 = arith.mulf %290, %258 : vector<2x32xf32>
    %295 = arith.mulf %289, %293 : vector<2x32xf32>
    %296 = arith.addf %294, %295 : vector<2x32xf32>
    %297 = math.tanh %296 : vector<2x32xf32>
    %298 = arith.mulf %291, %297 : vector<2x32xf32>
    %cst_55 = arith.constant dense<0.000000e+00> : vector<2x128xf32>
    %299 = tpu.matmul %298, %9, %cst_55 {dimension_numbers = #tpu.dot_dimension_numbers<[1], [0], [0], [1], [0, 0, 1, 1], [], []>} : vector<2x32xf32>, vector<32x128xf32>, vector<2x128xf32> -> vector<2x128xf32>
    %cst_56 = arith.constant dense<0.000000e+00> : vector<2x128xf32>
    %300 = tpu.matmul %280, %8, %cst_56 {dimension_numbers = #tpu.dot_dimension_numbers<[1], [0], [0], [1], [0, 0, 1, 1], [], []>} : vector<2x32xf32>, vector<32x128xf32>, vector<2x128xf32> -> vector<2x128xf32>
    %301 = arith.addf %299, %300 : vector<2x128xf32>
    %302 = vector.broadcast %10 : vector<1x128xf32> to vector<2x128xf32>
    %303 = arith.addf %301, %302 : vector<2x128xf32>
    %304 = arith.negf %303 : vector<2x128xf32>
    %305 = math.exp %304 : vector<2x128xf32>
    %cst_57 = arith.constant 1.000000e+00 : f32
    %306 = vector.broadcast %cst_57 : f32 to vector<2x128xf32>
    %307 = arith.addf %306, %305 : vector<2x128xf32>
    %308 = arith.divf %306, %307 : vector<2x128xf32>
    %309 = vector.extract_strided_slice %308 {offsets = [0, 0], sizes = [2, 32], strides = [1, 1]} : vector<2x128xf32> to vector<2x32xf32>
    %310 = vector.extract_strided_slice %308 {offsets = [0, 32], sizes = [2, 32], strides = [1, 1]} : vector<2x128xf32> to vector<2x32xf32>
    %311 = vector.extract_strided_slice %308 {offsets = [0, 96], sizes = [2, 32], strides = [1, 1]} : vector<2x128xf32> to vector<2x32xf32>
    %312 = vector.extract_strided_slice %303 {offsets = [0, 64], sizes = [2, 32], strides = [1, 1]} : vector<2x128xf32> to vector<2x32xf32>
    %313 = math.tanh %312 : vector<2x32xf32>
    %314 = arith.mulf %310, %278 : vector<2x32xf32>
    %315 = arith.mulf %309, %313 : vector<2x32xf32>
    %316 = arith.addf %314, %315 : vector<2x32xf32>
    %317 = math.tanh %316 : vector<2x32xf32>
    %318 = arith.mulf %311, %317 : vector<2x32xf32>
    %319 = tpu.concatenate %298, %318 in 0 : vector<2x32xf32>, vector<2x32xf32> -> vector<4x32xf32>
    %cst_58 = arith.constant 0.000000e+00 : f32
    %320 = vector.broadcast %cst_58 : f32 to vector<4x32xf32>
    %321 = arith.maximumf %319, %320 : vector<4x32xf32>
    %c0_59 = arith.constant 0 : index
    %c0_60 = arith.constant 0 : index
    %322 = vector.load %arg7[%c0_59, %c0_60] : memref<32x128xf32, #tpu.memory_space<vmem>>, vector<32x128xf32>
    %cst_61 = arith.constant dense<0.000000e+00> : vector<4x128xf32>
    %323 = tpu.matmul %321, %322, %cst_61 {dimension_numbers = #tpu.dot_dimension_numbers<[1], [0], [0], [1], [0, 0, 1, 1], [], []>} : vector<4x32xf32>, vector<32x128xf32>, vector<4x128xf32> -> vector<4x128xf32>
    %c0_62 = arith.constant 0 : index
    %c0_63 = arith.constant 0 : index
    %324 = vector.load %arg8[%c0_62, %c0_63] : memref<1x128xf32, #tpu.memory_space<vmem>>, vector<1x128xf32>
    %325 = vector.broadcast %324 : vector<1x128xf32> to vector<4x128xf32>
    %326 = arith.addf %323, %325 : vector<4x128xf32>
    %cst_64 = arith.constant 0.000000e+00 : f32
    %327 = vector.broadcast %cst_64 : f32 to vector<4x128xf32>
    %328 = arith.maximumf %326, %327 : vector<4x128xf32>
    %c0_65 = arith.constant 0 : index
    %c0_66 = arith.constant 0 : index
    %329 = vector.load %arg9[%c0_65, %c0_66] : memref<128x128xf32, #tpu.memory_space<vmem>>, vector<128x128xf32>
    %cst_67 = arith.constant dense<0.000000e+00> : vector<4x128xf32>
    %330 = tpu.matmul %328, %329, %cst_67 {dimension_numbers = #tpu.dot_dimension_numbers<[1], [0], [0], [1], [0, 0, 1, 1], [], []>} : vector<4x128xf32>, vector<128x128xf32>, vector<4x128xf32> -> vector<4x128xf32>
    %c0_68 = arith.constant 0 : index
    %c0_69 = arith.constant 0 : index
    %331 = vector.load %arg10[%c0_68, %c0_69] : memref<1x128xf32, #tpu.memory_space<vmem>>, vector<1x128xf32>
    %332 = vector.broadcast %331 : vector<1x128xf32> to vector<4x128xf32>
    %333 = arith.addf %330, %332 : vector<4x128xf32>
    %c0_70 = arith.constant 0 : index
    %c0_71 = arith.constant 0 : index
    %334 = vector.load %arg11[%c0_70, %c0_71] : memref<4x128xf32, #tpu.memory_space<vmem>>, vector<4x128xf32>
    tpu.vector_store %arg11[%c0_70, %c0_71], %333 {strides = array<i32>} : memref<4x128xf32, #tpu.memory_space<vmem>>, vector<4x128xf32>,
    return
  }
}

</mosaic_0001>

<bundles_post_ra>
// kernel: tpu_custom_call.1
= control target key start
LH: loop header
LB: loop body
LE: loop exit
PB: predicated region body
PF: predicated region fallthrough
CT: control target
= control target key end

     0   :  { %16 = vsyncpa [#allocation3], 0  ;;  %s4119_s0 = inlined_call_operand.hbm [shape: f32[8,2,16], index: 0, kind: input, shape index: {}]   ;;  %s4120_s1 = inlined_call_operand.hbm [shape: f32[16,128], index: 1, kind: input, shape index: {}]   ;;  %s4121_s2 = inlined_call_operand.hbm [shape: f32[32,128], index: 2, kind: input, shape index: {}]   ;;  %s4122_s3 = inlined_call_operand.vmem [shape: f32[1,128], index: 3, kind: input, shape index: {}]   ;;  %s4123_s4 = inlined_call_operand.hbm [shape: f32[32,128], index: 4, kind: input, shape index: {}]   ;;  %s4124_s5 = inlined_call_operand.hbm [shape: f32[32,128], index: 5, kind: input, shape index: {}]   ;;  %s4125_s6 = inlined_call_operand.vmem [shape: f32[1,128], index: 6, kind: input, shape index: {}]   ;;  %s4126_s7 = inlined_call_operand.hbm [shape: f32[32,128], index: 7, kind: input, shape index: {}]   ;;  %s4127_s8 = inlined_call_operand.vmem [shape: f32[1,128], index: 8, kind: input, shape index: {}]   ;;  %s4128_s9 = inlined_call_operand.hbm [shape: f32[128,128], index: 9, kind: input, shape index: {}]   ;;  %s4129_s10 = inlined_call_operand.vmem [shape: f32[1,128], index: 10, kind: input, shape index: {}]   ;;  %s4130_s11 = inlined_call_operand.hbm [shape: f32[4,128], index: 11, kind: output, shape index: {}]  }
   0x1   :  { %17 = vsyncpa [#allocation6], 0 }
   0x2   :  { %18 = vsyncpa [#allocation9], 0 }
   0x3   :  { %19 = vsyncpa [#allocation12], 0 }
   0x4   :  { %20 = vsyncpa [#allocation4], 0  ;;  %s3537_s17 = smov [#allocation5]  }
   0x5   :  { %s38_s18 = sshll.u32 %s3537_s17, 4  ;;  %s39_s18 = int_to_ptr.vmem [resolvable:$true] %s38_s18 }
   0x6   :  { %s3375_s19 = scalar_lea.vmem %s39_s18, 256  ;;  %p3380_p1 = scmp.lt.s32.totalorder %s39_s18, %s39_s18 }
   0x7   :  { %p3376_p0 = scmp.ne.s32.totalorder %s39_s18, %s3375_s19  ;;  %p3381_p2 = scmp.lt.s32.totalorder %s3375_s19, %s3375_s19 }
   0x9   :  { %p3382_p3 = por %p3381_p2, %p3380_p1 }
   0xb   :  { %p3383_p4 = pnand %p3382_p3, %p3376_p0 }
   0xd   :  { %3386 = shalt.err (!%p3383_p4)
}
   0xe   :  { %s3538_s20 = smov 128   ;;  %s3539_s21 = smov 8  }
   0xf   :  { %44 = dma.hbm_to_vmem [thread:$0]  %s4120_s1, 256, %s39_s18, [#allocation6], %s3538_s20, %s3538_s20, %s3539_s21  }
  0x10   :  { %s3540_s24 = smov [#allocation8]   ;;  %s3541_s26 = smov [#allocation11]  }
  0x11   :  { %s64_s25 = sshll.u32 %s3540_s24, 4  ;;  %s90_s27 = sshll.u32 %s3541_s26, 4  ;;  %s65_s25 = int_to_ptr.vmem [resolvable:$true] %s64_s25  ;;  %s91_s27 = int_to_ptr.vmem [resolvable:$true] %s90_s27 }
  0x12   :  { %s3395_s28 = scalar_lea.vmem %s65_s25, 512  ;;  %p3400_p6 = scmp.lt.s32.totalorder %s65_s25, %s65_s25 }
  0x13   :  { %p3396_p5 = scmp.ne.s32.totalorder %s65_s25, %s3395_s28  ;;  %p3401_p7 = scmp.lt.s32.totalorder %s3395_s28, %s3395_s28 }
  0x15   :  { %p3402_p8 = por %p3401_p7, %p3400_p6 }
  0x17   :  { %p3403_p9 = pnand %p3402_p8, %p3396_p5 }
  0x19   :  { %3406 = shalt.err (!%p3403_p9)
}
  0x1a   :  { %70 = dma.hbm_to_vmem [thread:$0]  %s4123_s4, 512, %s65_s25, [#allocation9], %s3538_s20, %s3538_s20, %s3539_s21  }
  0x1b   :  { %s3415_s1 = scalar_lea.vmem %s91_s27, 512  ;;  %p3420_p11 = scmp.lt.s32.totalorder %s91_s27, %s91_s27 }
  0x1c   :  { %p3416_p10 = scmp.ne.s32.totalorder %s91_s27, %s3415_s1  ;;  %p3421_p12 = scmp.lt.s32.totalorder %s3415_s1, %s3415_s1 }
  0x1e   :  { %p3422_p13 = por %p3421_p12, %p3420_p11 }
  0x20   :  { %p3423_p0 = pnand %p3422_p13, %p3416_p10 }
  0x22   :  { %3426 = shalt.err (!%p3423_p0)
}
  0x23   :  { %96 = dma.hbm_to_vmem [thread:$0]  %s4126_s7, 512, %s91_s27, [#allocation12], %s3538_s20, %s3538_s20, %s3539_s21  }
  0x24   :  { %s3542_s14 = smov [#allocation2]  }
  0x25   :  { %s26_s15 = sshll.u32 %s3542_s14, 4  ;;  %s27_s15 = int_to_ptr.vmem [resolvable:$true] %s26_s15 }
  0x26   :  { %s3435_s16 = scalar_lea.vmem %s27_s15, 256  ;;  %p3440_p2 = scmp.lt.s32.totalorder %s27_s15, %s27_s15 }
  0x27   :  { %p3436_p1 = scmp.ne.s32.totalorder %s27_s15, %s3435_s16  ;;  %p3441_p3 = scmp.lt.s32.totalorder %s3435_s16, %s3435_s16 }
  0x29   :  { %p3442_p4 = por %p3441_p3, %p3440_p2 }
  0x2b   :  { %p3443_p5 = pnand %p3442_p4, %p3436_p1 }
  0x2d   :  { %3446 = shalt.err (!%p3443_p5)
}
  0x2e   :  { %s3543_s4 = smov 32   ;;  %s3544_s17 = smov 2  }
  0x2f   :  { %32 = dma.hbm_to_vmem [thread:$0]  %s4119_s0, 256, %s27_s15, [#allocation3], %s3543_s4, %s3543_s4, %s3544_s17  }
  0x30   :  { %s3545_s22 = smov [#allocation7]   ;;  %s3546_s23 = smov [#allocation10]  }
  0x31   :  { %s50_s7 = sshll.u32 %s3545_s22, 4  ;;  %s76_s24 = sshll.u32 %s3546_s23, 4  ;;  %s51_s7 = int_to_ptr.vmem [resolvable:$true] %s50_s7  ;;  %s77_s24 = int_to_ptr.vmem [resolvable:$true] %s76_s24 }
  0x32   :  { %s3455_s25 = scalar_lea.vmem %s51_s7, 512  ;;  %p3460_p7 = scmp.lt.s32.totalorder %s51_s7, %s51_s7 }
  0x33   :  { %p3456_p6 = scmp.ne.s32.totalorder %s51_s7, %s3455_s25  ;;  %p3461_p8 = scmp.lt.s32.totalorder %s3455_s25, %s3455_s25 }
  0x35   :  { %p3462_p9 = por %p3461_p8, %p3460_p7 }
  0x37   :  { %p3463_p10 = pnand %p3462_p9, %p3456_p6 }
  0x39   :  { %3466 = shalt.err (!%p3463_p10)
}
  0x3a   :  { %56 = dma.hbm_to_vmem [thread:$0]  %s4121_s2, 512, %s51_s7, [#allocation6], %s3538_s20, %s3538_s20, %s3539_s21  }
  0x3b   :  { %s3475_s0 = scalar_lea.vmem %s77_s24, 512  ;;  %p3480_p12 = scmp.lt.s32.totalorder %s77_s24, %s77_s24 }
  0x3c   :  { %p3476_p11 = scmp.ne.s32.totalorder %s77_s24, %s3475_s0  ;;  %p3481_p13 = scmp.lt.s32.totalorder %s3475_s0, %s3475_s0 }
  0x3e   :  { %p3482_p0 = por %p3481_p13, %p3480_p12 }
  0x40   :  { %p3483_p1 = pnand %p3482_p0, %p3476_p11 }
  0x42   :  { %3486 = shalt.err (!%p3483_p1)
}
  0x43   :  { %82 = dma.hbm_to_vmem [thread:$0]  %s4124_s5, 512, %s77_s24, [#allocation9], %s3538_s20, %s3538_s20, %s3539_s21  }
  0x44   :  { %s3547_s30 = smov [#allocation13]  }
  0x45   :  { %s104_s1 = sshll.u32 %s3547_s30, 4  ;;  %s105_s1 = int_to_ptr.vmem [resolvable:$true] %s104_s1 }
  0x46   :  { %s3495_s12 = scalar_lea.vmem %s105_s1, 2048  ;;  %p3500_p3 = scmp.lt.s32.totalorder %s105_s1, %s105_s1 }
  0x47   :  { %p3496_p2 = scmp.ne.s32.totalorder %s105_s1, %s3495_s12  ;;  %p3501_p4 = scmp.lt.s32.totalorder %s3495_s12, %s3495_s12 }
  0x49   :  { %p3502_p5 = por %p3501_p4, %p3500_p3 }
  0x4b   :  { %p3503_p6 = pnand %p3502_p5, %p3496_p2 }
  0x4d   :  { %3506 = shalt.err (!%p3503_p6)
}
  0x4e   :  { %110 = dma.hbm_to_vmem [thread:$0]  %s4128_s9, 2048, %s105_s1, [#allocation12], %s3538_s20, %s3538_s20, %s3539_s21  }
  0x4f   :  { %3527 = dma.done.wait [#allocation3], 256  }
  0x50   :  { %3528 = vsyncadd [#allocation3], 4294967040 }
  0x51   :  { %3529 = dma.done.wait [#allocation6], 768  }
  0x52   :  { %3530 = vsyncadd [#allocation6], 4294966528 }
  0x53   :  { %3531 = dma.done.wait [#allocation9], 1024  }
  0x54   :  { %3532 = vsyncadd [#allocation9], 4294966272 }
  0x55   :  { %3533 = dma.done.wait [#allocation12], 2560  }
  0x56   :  { %3534 = vsyncadd [#allocation12], 4294964736  ;;  %v164_v0 = vlaneseq  ;;  %v3548_v1 = vmov 1983009808   ;;  %v3549_v3 = vmov 0.0   ;;  %vm3550_vm0 = vmmov 0  }
  0x57   :  { %v162_v2 = vunpack.c.l.s4 %v3548_v1  ;;  %2933 = vmatprep.subr.mxu0 %v3549_v3  ;;  %2941 = vmatprep.mubr.msk.f32.mxu0 %vm3550_vm0, %v3549_v3  ;;  %v143_v6 = vld [vmem:[#allocation5 + $0x8] sm:$0xff]  ;;  %v142_v7 = vld [vmem:[#allocation5] sm:$0xff]  ;;  %v134_v8 = vld [vmem:[#allocation2] sm:$0x3]  ;;  %vm193_vm1 = vcmask 130048   ;;  %s3551_s20 = smov 64  }
  0x58   :  { %v165_v5 = vshrl.u32 %v164_v0, 7  ;;  %2893 = vmatprep.subr.mxu1 %v143_v6  ;;  %v135_v10 = vld [vmem:[#allocation2 + $0x2] sm:$0x3]  ;;  %v136_v11 = vld [vmem:[#allocation2 + $0x4] sm:$0x3]  ;;  %v3657_v20 = vld [vmem:[#allocation7 + $0x18] sm:$0xff] }
  0x59   :  { %v163_v4 = vunpack.c.0.s8 %v162_v2  ;;  %v137_v12 = vld [vmem:[#allocation2 + $0x6] sm:$0x3]  ;;  %2894 = vmatpush3.msra.mxu1 %v143_v6  ;;  %v159_v13 = vcombine.low %v134_v8, %v135_v10  ;;  %v138_v15 = vld [vmem:[#allocation2 + $0x8] sm:$0x3]  ;;  %v139_v16 = vld [vmem:[#allocation2 + $0xa] sm:$0x3]  ;;  %2934 = vmatpush3.msra.mxu0 %v3657_v20 }
  0x5a   :  { %v160_v14 = vcombine.low %v136_v11, %v137_v12  ;;  %v140_v17 = vld [vmem:[#allocation2 + $0xc] sm:$0x3]  ;;  %2895 = vmatprep.subr.mxu1 %v142_v7  ;;  %v141_v18 = vld [vmem:[#allocation2 + $0xe] sm:$0x3]  ;;  %v176_v19 = vcombine.low %v138_v15, %v139_v16  ;;  %v3661_v25 = vld [vmem:[#allocation7 + $0x10] sm:$0xff]  ;;  %2935 = vmatprep.subr.mxu0 %v3549_v3  ;;  %vm286_vm2 = vcmask 261120  }
  0x5b   :  { %v166_v9 = vsub.s32 %v163_v4, %v165_v5  ;;  %2896 = vmatpush3.msra.mxu1 %v142_v7  ;;  %v177_v23 = vcombine.low %v140_v17, %v141_v18  ;;  %2936 = vmatpush3.msra.mxu0 %v3661_v25  ;;  %v3665_v28 = vld [vmem:[#allocation7 + $0x8] sm:$0xff]  ;;  %v3669_v30 = vld [vmem:[#allocation7] sm:$0xff]  ;;  %v3700_v49 = vld [vmem:[#allocation10 + $0x18] sm:$0xff]  ;;  %vm2500_vm3 = vcmask 1041408   ;;  %s3552_s18 = smov [#allocation14]  }
  0x5c   :  { %2900 = vmatprep.subr.mxu1 %v3549_v3  ;;  %2937 = vmatprep.subr.mxu0 %v3549_v3  ;;  %v2702_v31 = vld [vmem:[%s4122_s3] ss:$0 sm:$0xff]  ;;  %v3702_v50 = vld [vmem:[#allocation10 + $0x10] sm:$0xff]  ;;  %v3706_v51 = vld [vmem:[#allocation10 + $0x8] sm:$0xff]  ;;  %s2690_s19 = sshll.u32 %s3552_s18, 4  ;;  %s2691_s19 = int_to_ptr.vmem [resolvable:$true] %s2690_s19 }
  0x5d   :  { %v167_v21 = vrot.slane %v159_v13, %v166_v9  ;;  %v174_v22 = vrot.slane %v160_v14, %v166_v9  ;;  %v184_v24 = vrot.slane %v176_v19, %v166_v9  ;;  %v191_v27 = vrot.slane %v177_v23, %v166_v9  ;;  %2938 = vmatpush3.msra.mxu0 %v3665_v28  ;;  %v3710_v52 = vld [vmem:[#allocation10] sm:$0xff]  ;;  %v3714_v53 = vld [vmem:[#allocation8 + $0x18] sm:$0xff]  ;;  %v3719_v54 = vld [vmem:[#allocation8 + $0x10] sm:$0xff]  ;;  %s3507_s22 = scalar_lea.vmem %s2691_s19, 64  ;;  %p3512_p8 = scmp.lt.s32.totalorder %s2691_s19, %s2691_s19 }
  0x5e   :  { %2939 = vmatprep.subr.mxu0 %v3549_v3  ;;  %v3725_v56 = vld [vmem:[#allocation8 + $0x8] sm:$0xff]  ;;  %v3730_v57 = vld [vmem:[#allocation8] sm:$0xff]  ;;  %p3508_p7 = scmp.ne.s32.totalorder %s2691_s19, %s3507_s22  ;;  %p3513_p9 = scmp.lt.s32.totalorder %s3507_s22, %s3507_s22 }
  0x5f   :  { %v175_v26 = vcombine.low %v167_v21, %v174_v22  ;;  %v192_v29 = vcombine.low %v184_v24, %v191_v27  ;;  %2940 = vmatpush3.msra.mxu0 %v3669_v30  ;;  %v3762_v63 = vld [vmem:[%s4125_s6] ss:$0 sm:$0xff] }
  0x60   :  { %2955 = vmatprep.subr.mxu0 %v3549_v3  ;;  %p3514_p10 = por %p3513_p9, %p3512_p8 }
  0x61   :  { %2897 = vmatprep.mubr.msk.f32.mxu1 %vm193_vm1, %v175_v26 }
  0x62   :  { %2898 = vmatmul.mubr.msk.f32.vlgmr.msra.gmra.mxu1 %vm193_vm1, %v192_v29  ;;  %p3515_p11 = pnand %p3514_p10, %p3508_p7 }
  0x63   :  { %2901 = vmatpush3.msra.mxu1 %v3657_v20  ;;  %2908 = vmatprep.mubr.msk.f32.mxu1 %vm3550_vm0, %v3549_v3 }
  0x64   :  { %2902 = vmatprep.subr.mxu1 %v3549_v3 }
  0x65   :  { %2903 = vmatpush3.msra.mxu1 %v3661_v25 }
  0x66   :  { %2904 = vmatprep.subr.mxu1 %v3549_v3 }
  0x67   :  { %2905 = vmatpush3.msra.mxu1 %v3665_v28 }
  0x68   :  { %2906 = vmatprep.subr.mxu1 %v3549_v3 }
  0x69   :  { %2907 = vmatpush3.msra.mxu1 %v3669_v30 }
  0x6a   :  { %2909 = vmatmul.mubr.f32.vlgmr.msra.gmra.mxu1 %v3549_v3  ;;  %2911 = vmatprep.subr.mxu1 %v3549_v3 }
  0x6b   :  { %2919 = vmatprep.mubr.msk.f32.mxu1 %vm3550_vm0, %v3549_v3  ;;  %2912 = vmatpush3.msra.mxu1 %v3700_v49 }
  0x6c   :  { %2913 = vmatprep.subr.mxu1 %v3549_v3 }
  0x6d   :  { %2914 = vmatpush3.msra.mxu1 %v3702_v50 }
  0x6e   :  { %2915 = vmatprep.subr.mxu1 %v3549_v3 }
  0x6f   :  { %2916 = vmatpush3.msra.mxu1 %v3706_v51 }
  0x70   :  { %2917 = vmatprep.subr.mxu1 %v3549_v3 }
  0x71   :  { %2918 = vmatpush3.msra.mxu1 %v3710_v52 }
  0x72   :  { %2920 = vmatmul.mubr.f32.vlgmr.msra.gmra.mxu1 %v3549_v3  ;;  %2922 = vmatprep.subr.mxu1 %v3549_v3 }
  0x73   :  { %2923 = vmatpush3.msra.mxu1 %v3714_v53  ;;  %2930 = vmatprep.mubr.msk.f32.mxu1 %vm3550_vm0, %v3549_v3 }
  0x74   :  { %2924 = vmatprep.subr.mxu1 %v3549_v3 }
  0x75   :  { %2925 = vmatpush3.msra.mxu1 %v3719_v54 }
  0x76   :  { %2926 = vmatprep.subr.mxu1 %v3549_v3 }
  0x77   :  { %2927 = vmatpush3.msra.mxu1 %v3725_v56 }
  0x78   :  { %2928 = vmatprep.subr.mxu1 %v3549_v3 }
  0x79   :  { %2929 = vmatpush3.msra.mxu1 %v3730_v57 }
  0x7a   :  { %2944 = vmatprep.subr.mxu1 %v3549_v3 }
 0x122   :  { %v2899_v32 = vpop.f32.mrf.mxu1 }
 0x123   :  { %v3690_v33 = vadd.f32 %v2899_v32, %v2702_v31 }
 0x124   :  { %v264_v34 = vpop.f32.mrf.mxu1 }
 0x125   :  { %v3692_v35 = vadd.f32 %v2702_v31, %v264_v34 }
 0x12a   :  { %v356_v36 = vpop.f32.mrf.mxu1 }
 0x12b   :  { %v360_v37 = vadd.f32 %v356_v36, %v3692_v35 }
 0x12c   :  { %v2910_v38 = vpop.f32.mrf.mxu1 }
 0x12d   :  { %3226 = vtanh.f32 %v360_v37  ;;  %v2705_v40 = vmul.f32 -1.442695, %v360_v37 }
 0x12f   :  { %3228 = vpow2.f32 %v2705_v40 }
 0x132   :  { %v451_v60 = vpop.f32.mrf.mxu1 }
 0x134   :  { %v2921_v61 = vpop.f32.mrf.mxu1 }
 0x13a   :  { %v3227_v39 = vpop.eup %3226 }
 0x13b   :  { %370 = vrot.lane.b32.xlu0 %v3227_v39, %s3551_s20 }
 0x13c   :  { %v3229_v41 = vpop.eup %3228 }
 0x13d   :  { %v364_v42 = vadd.f32 1.0, %v3229_v41 }
 0x13f   :  { %3230 = vrcp.f32 %v364_v42 }
 0x14c   :  { %v3231_v43 = vpop.eup %3230 }
 0x14d   :  { %v368_v46 = vmul.f32 0.0, %v3231_v43 }
 0x1ad   :  { %v371_v44 = vpop.permute.xlu0 %370 }
 0x1ae   :  { %v373_v45 = vmul.f32 %v3231_v43, %v371_v44 }
 0x1b0   :  { %375 = vrot.lane.b32.xlu0 %v373_v45, %s3543_s4 }
 0x222   :  { %v376_v47 = vpop.permute.xlu0 %375 }
 0x223   :  { %v3697_v48 = vadd.f32 %v376_v47, %v368_v46 }
 0x225   :  { %3232 = vtanh.f32 %v3697_v48  ;;  %v643_v24 = vrot.slane %v3697_v48, 6 }
 0x232   :  { %v3233_v55 = vpop.eup %3232 }
 0x233   :  { %381 = vrot.lane.b32.xlu1 %v3233_v55, %s3551_s20 }
 0x2a5   :  { %v382_v58 = vpop.permute.xlu1 %381 }
 0x2a6   :  { %v384_v59 = vmul.f32 %v3231_v43, %v382_v58 }
 0x2a8   :  { %456 = vrot.lane.b32.xlu1 %v384_v59, %s3543_s4 }
 0x31a   :  { %v457_v62 = vpop.permute.xlu1 %456 }
 0x31b   :  { %2931 = vmatmul.mubr.msk.f32.vlgmr.msra.gmra.mxu1 %vm286_vm2, %v457_v62  ;;  %2942 = vmatmul.mubr.msk.f32.vlgmr.msra.gmra.mxu0 %vm286_vm2, %v457_v62 }
 0x31c   :  { %2945 = vmatpush3.msra.mxu1 %v3700_v49  ;;  %2956 = vmatpush3.msra.mxu0 %v3714_v53 }
 0x31d   :  { %2946 = vmatprep.subr.mxu1 %v3549_v3  ;;  %2957 = vmatprep.subr.mxu0 %v3549_v3 }
 0x31e   :  { %2947 = vmatpush3.msra.mxu1 %v3702_v50  ;;  %2958 = vmatpush3.msra.mxu0 %v3719_v54 }
 0x31f   :  { %2948 = vmatprep.subr.mxu1 %v3549_v3  ;;  %2959 = vmatprep.subr.mxu0 %v3549_v3 }
 0x320   :  { %2949 = vmatpush3.msra.mxu1 %v3706_v51  ;;  %2952 = vmatprep.mubr.msk.f32.mxu1 %vm3550_vm0, %v3549_v3 }
 0x321   :  { %2950 = vmatprep.subr.mxu1 %v3549_v3  ;;  %2960 = vmatpush3.msra.mxu0 %v3725_v56 }
 0x322   :  { %2951 = vmatpush3.msra.mxu1 %v3710_v52  ;;  %2961 = vmatprep.subr.mxu0 %v3549_v3 }
 0x323   :  { %2966 = vmatprep.subr.mxu1 %v3549_v3  ;;  %2962 = vmatpush3.msra.mxu0 %v3730_v57 }
 0x324   :  { %2963 = vmatprep.mubr.msk.f32.mxu0 %vm3550_vm0, %v3549_v3  ;;  %2977 = vmatprep.subr.mxu0 %v3549_v3 }
 0x3db   :  { %v526_v0 = vpop.f32.mrf.mxu1  ;;  %v627_v1 = vpop.f32.mrf.mxu0 }
 0x3dc   :  { %v527_v2 = vadd.f32 %v526_v0, %v451_v60  ;;  %v632_v4 = vrot.slane %v627_v1, 6 }
 0x3dd   :  { %v2932_v5 = vpop.f32.mrf.mxu1  ;;  %v2943_v6 = vpop.f32.mrf.mxu0 }
 0x3de   :  { %v536_v7 = vadd.f32 %v3762_v63, %v527_v2  ;;  %v634_v8 = vadd.f32 %v632_v4, %v3692_v35 }
 0x3e0   :  { %3234 = vtanh.f32 %v536_v7  ;;  %v2708_v11 = vmul.f32 -1.442695, %v536_v7  ;;  %v2710_v12 = vmul.f32 -1.442695, %v634_v8 }
 0x3e1   :  { %3236 = vtanh.f32 %v634_v8 }
 0x3e2   :  { %3238 = vpow2.f32 %v2708_v11 }
 0x3e3   :  { %3240 = vpow2.f32 %v2710_v12 }
 0x3ed   :  { %v3235_v9 = vpop.eup %3234 }
 0x3ee   :  { %v3237_v10 = vpop.eup %3236  ;;  %546 = vrot.lane.b32.xlu0 %v3235_v9, %s3551_s20 }
 0x3ef   :  { %647 = vrot.lane.b32.xlu1 %v3237_v10, %s3551_s20  ;;  %v3239_v13 = vpop.eup %3238 }
 0x3f0   :  { %v3241_v14 = vpop.eup %3240  ;;  %v540_v15 = vadd.f32 1.0, %v3239_v13 }
 0x3f1   :  { %v638_v16 = vadd.f32 1.0, %v3241_v14 }
 0x3f2   :  { %3242 = vrcp.f32 %v540_v15 }
 0x3f3   :  { %3244 = vrcp.f32 %v638_v16 }
 0x3ff   :  { %v3243_v17 = vpop.eup %3242 }
 0x400   :  { %v3245_v19 = vpop.eup %3244  ;;  %v544_v26 = vmul.f32 0.0, %v3243_v17 }
 0x401   :  { %v645_v27 = vmul.f32 %v3245_v19, %v643_v24 }
 0x460   :  { %v547_v18 = vpop.permute.xlu0 %546 }
 0x461   :  { %v648_v21 = vpop.permute.xlu1 %647  ;;  %v549_v22 = vmul.f32 %v3243_v17, %v547_v18 }
 0x462   :  { %v650_v23 = vmul.f32 %v3245_v19, %v648_v21 }
 0x463   :  { %551 = vrot.lane.b32.xlu0 %v549_v22, %s3543_s4 }
 0x464   :  { %652 = vrot.lane.b32.xlu1 %v650_v23, %s3543_s4 }
 0x4d5   :  { %v552_v29 = vpop.permute.xlu0 %551 }
 0x4d6   :  { %v653_v31 = vpop.permute.xlu1 %652  ;;  %v3771_v32 = vadd.f32 %v552_v29, %v544_v26 }
 0x4d7   :  { %v3773_v34 = vadd.f32 %v653_v31, %v645_v27 }
 0x4d8   :  { %3246 = vtanh.f32 %v3771_v32 }
 0x4d9   :  { %3248 = vtanh.f32 %v3773_v34  ;;  %v920_v18 = vrot.slane %v3773_v34, 6 }
 0x4e5   :  { %v3247_v36 = vpop.eup %3246 }
 0x4e6   :  { %v3249_v37 = vpop.eup %3248  ;;  %557 = vrot.lane.b32.xlu0 %v3247_v36, %s3551_s20 }
 0x4e7   :  { %658 = vrot.lane.b32.xlu1 %v3249_v37, %s3551_s20 }
 0x558   :  { %v558_v38 = vpop.permute.xlu0 %557 }
 0x559   :  { %v659_v39 = vpop.permute.xlu1 %658  ;;  %v560_v40 = vmul.f32 %v3243_v17, %v558_v38 }
 0x55a   :  { %v661_v41 = vmul.f32 %v3245_v19, %v659_v39 }
 0x55b   :  { %663 = vrot.lane.b32.xlu0 %v560_v40, %s3543_s4 }
 0x55c   :  { %v738_v42 = vrot.slane %v661_v41, 2 }
 0x55e   :  { %739 = vrot.lane.b32.xlu1 %v738_v42, %s3543_s4 }
 0x5cd   :  { %v664_v43 = vpop.permute.xlu0 %663 }
 0x5ce   :  { %2953 = vmatmul.mubr.msk.f32.vlgmr.msra.gmra.mxu1 %vm286_vm2, %v664_v43 }
 0x5cf   :  { %2967 = vmatpush3.msra.mxu1 %v3657_v20  ;;  %2974 = vmatprep.mubr.msk.f32.mxu1 %vm3550_vm0, %v3549_v3 }
 0x5d0   :  { %v740_v44 = vpop.permute.xlu1 %739  ;;  %2968 = vmatprep.subr.mxu1 %v3549_v3 }
 0x5d1   :  { %2964 = vmatmul.mubr.msk.f32.vlgmr.msra.gmra.mxu0 %vm286_vm2, %v740_v44  ;;  %2969 = vmatpush3.msra.mxu1 %v3661_v25 }
 0x5d2   :  { %2970 = vmatprep.subr.mxu1 %v3549_v3  ;;  %2978 = vmatpush3.msra.mxu0 %v3700_v49 }
 0x5d3   :  { %2971 = vmatpush3.msra.mxu1 %v3665_v28  ;;  %2979 = vmatprep.subr.mxu0 %v3549_v3 }
 0x5d4   :  { %2972 = vmatprep.subr.mxu1 %v3549_v3  ;;  %2980 = vmatpush3.msra.mxu0 %v3702_v50 }
 0x5d5   :  { %2973 = vmatpush3.msra.mxu1 %v3669_v30  ;;  %2981 = vmatprep.subr.mxu0 %v3549_v3 }
 0x5d6   :  { %2975 = vmatmul.mubr.msk.f32.vlgmr.msra.gmra.mxu1 %vm286_vm2, %v740_v44  ;;  %2982 = vmatpush3.msra.mxu0 %v3706_v51 }
 0x5d7   :  { %2983 = vmatprep.subr.mxu0 %v3549_v3  ;;  %2985 = vmatprep.mubr.msk.f32.mxu0 %vm3550_vm0, %v3549_v3 }
 0x5d8   :  { %2984 = vmatpush3.msra.mxu0 %v3710_v52  ;;  %2988 = vmatprep.subr.mxu1 %v3549_v3 }
 0x5d9   :  { %2999 = vmatprep.subr.mxu0 %v3549_v3  ;;  %2989 = vmatpush3.msra.mxu1 %v3714_v53 }
 0x5da   :  { %2990 = vmatprep.subr.mxu1 %v3549_v3  ;;  %2996 = vmatprep.mubr.msk.f32.mxu1 %vm3550_vm0, %v3549_v3 }
 0x5db   :  { %2991 = vmatpush3.msra.mxu1 %v3719_v54 }
 0x5dc   :  { %2992 = vmatprep.subr.mxu1 %v3549_v3 }
 0x5dd   :  { %2993 = vmatpush3.msra.mxu1 %v3725_v56 }
 0x5de   :  { %2994 = vmatprep.subr.mxu1 %v3549_v3 }
 0x5df   :  { %2995 = vmatpush3.msra.mxu1 %v3730_v57 }
 0x5e0   :  { %3010 = vmatprep.subr.mxu1 %v3549_v3 }
 0x68e   :  { %v733_v45 = vpop.f32.mrf.mxu1 }
 0x690   :  { %v2954_v46 = vpop.f32.mrf.mxu1 }
 0x691   :  { %v809_v47 = vpop.f32.mrf.mxu0 }
 0x692   :  { %v810_v48 = vadd.f32 %v809_v47, %v733_v45 }
 0x693   :  { %v2965_v55 = vpop.f32.mrf.mxu0 }
 0x694   :  { %v813_v58 = vadd.f32 %v3762_v63, %v810_v48 }
 0x696   :  { %3250 = vtanh.f32 %v813_v58  ;;  %v904_v59 = vpop.f32.mrf.mxu1  ;;  %v2713_v2 = vmul.f32 -1.442695, %v813_v58 }
 0x697   :  { %v909_v60 = vrot.slane %v904_v59, 4 }
 0x698   :  { %v2976_v61 = vpop.f32.mrf.mxu1 }
 0x699   :  { %v911_v62 = vadd.f32 %v909_v60, %v3692_v35 }
 0x69b   :  { %3252 = vtanh.f32 %v911_v62  ;;  %v2715_v4 = vmul.f32 -1.442695, %v911_v62 }
 0x69c   :  { %3254 = vpow2.f32 %v2713_v2 }
 0x69d   :  { %3256 = vpow2.f32 %v2715_v4 }
 0x6a3   :  { %v3251_v0 = vpop.eup %3250 }
 0x6a4   :  { %823 = vrot.lane.b32.xlu0 %v3251_v0, %s3551_s20 }
 0x6a8   :  { %v3253_v1 = vpop.eup %3252 }
 0x6a9   :  { %924 = vrot.lane.b32.xlu1 %v3253_v1, %s3551_s20  ;;  %v3255_v5 = vpop.eup %3254 }
 0x6aa   :  { %v817_v6 = vadd.f32 1.0, %v3255_v5  ;;  %v3257_v7 = vpop.eup %3256 }
 0x6ab   :  { %v915_v8 = vadd.f32 1.0, %v3257_v7 }
 0x6ac   :  { %3258 = vrcp.f32 %v817_v6 }
 0x6ad   :  { %3260 = vrcp.f32 %v915_v8 }
 0x6b9   :  { %v3259_v9 = vpop.eup %3258 }
 0x6ba   :  { %v3261_v12 = vpop.eup %3260  ;;  %v821_v15 = vmul.f32 %v3259_v9, %v3771_v32 }
 0x6bb   :  { %v922_v19 = vmul.f32 %v3261_v12, %v920_v18 }
 0x716   :  { %v824_v10 = vpop.permute.xlu0 %823 }
 0x717   :  { %v826_v11 = vmul.f32 %v3259_v9, %v824_v10 }
 0x719   :  { %828 = vrot.lane.b32.xlu0 %v826_v11, %s3543_s4 }
 0x71b   :  { %v925_v13 = vpop.permute.xlu1 %924 }
 0x71c   :  { %v927_v14 = vmul.f32 %v3261_v12, %v925_v13 }
 0x71e   :  { %929 = vrot.lane.b32.xlu1 %v927_v14, %s3543_s4 }
 0x78b   :  { %v829_v16 = vpop.permute.xlu0 %828 }
 0x78c   :  { %v3821_v17 = vadd.f32 %v829_v16, %v821_v15 }
 0x78e   :  { %3262 = vtanh.f32 %v3821_v17 }
 0x790   :  { %v930_v21 = vpop.permute.xlu1 %929 }
 0x791   :  { %v3825_v22 = vadd.f32 %v930_v21, %v922_v19 }
 0x793   :  { %3264 = vtanh.f32 %v3825_v22  ;;  %v1197_v6 = vrot.slane %v3825_v22, 6 }
 0x79b   :  { %v3263_v23 = vpop.eup %3262 }
 0x79c   :  { %834 = vrot.lane.b32.xlu0 %v3263_v23, %s3551_s20 }
 0x7a0   :  { %v3265_v24 = vpop.eup %3264 }
 0x7a1   :  { %935 = vrot.lane.b32.xlu1 %v3265_v24, %s3551_s20 }
 0x80e   :  { %v835_v26 = vpop.permute.xlu0 %834 }
 0x80f   :  { %v837_v27 = vmul.f32 %v3259_v9, %v835_v26 }
 0x811   :  { %940 = vrot.lane.b32.xlu0 %v837_v27, %s3543_s4 }
 0x813   :  { %v936_v29 = vpop.permute.xlu1 %935 }
 0x814   :  { %v938_v31 = vmul.f32 %v3261_v12, %v936_v29 }
 0x816   :  { %v1015_v32 = vrot.slane %v938_v31, 4 }
 0x818   :  { %1016 = vrot.lane.b32.xlu1 %v1015_v32, %s3543_s4 }
 0x883   :  { %v941_v34 = vpop.permute.xlu0 %940 }
 0x884   :  { %2986 = vmatmul.mubr.msk.f32.vlgmr.msra.gmra.mxu0 %vm286_vm2, %v941_v34 }
 0x885   :  { %3000 = vmatpush3.msra.mxu0 %v3657_v20  ;;  %3007 = vmatprep.mubr.msk.f32.mxu0 %vm3550_vm0, %v3549_v3 }
 0x886   :  { %3001 = vmatprep.subr.mxu0 %v3549_v3 }
 0x887   :  { %3002 = vmatpush3.msra.mxu0 %v3661_v25 }
 0x888   :  { %3003 = vmatprep.subr.mxu0 %v3549_v3 }
 0x889   :  { %3004 = vmatpush3.msra.mxu0 %v3665_v28 }
 0x88a   :  { %3005 = vmatprep.subr.mxu0 %v3549_v3  ;;  %v1017_v36 = vpop.permute.xlu1 %1016 }
 0x88b   :  { %3006 = vmatpush3.msra.mxu0 %v3669_v30  ;;  %2997 = vmatmul.mubr.msk.f32.vlgmr.msra.gmra.mxu1 %vm286_vm2, %v1017_v36 }
 0x88c   :  { %3008 = vmatmul.mubr.msk.f32.vlgmr.msra.gmra.mxu0 %vm286_vm2, %v1017_v36  ;;  %3011 = vmatpush3.msra.mxu1 %v3700_v49 }
 0x88d   :  { %3012 = vmatprep.subr.mxu1 %v3549_v3  ;;  %3021 = vmatprep.subr.mxu0 %v3549_v3 }
 0x88e   :  { %3013 = vmatpush3.msra.mxu1 %v3702_v50  ;;  %3022 = vmatpush3.msra.mxu0 %v3714_v53 }
 0x88f   :  { %3014 = vmatprep.subr.mxu1 %v3549_v3  ;;  %3023 = vmatprep.subr.mxu0 %v3549_v3 }
 0x890   :  { %3015 = vmatpush3.msra.mxu1 %v3706_v51  ;;  %3024 = vmatpush3.msra.mxu0 %v3719_v54 }
 0x891   :  { %3016 = vmatprep.subr.mxu1 %v3549_v3  ;;  %3025 = vmatprep.subr.mxu0 %v3549_v3 }
 0x892   :  { %3017 = vmatpush3.msra.mxu1 %v3710_v52  ;;  %3018 = vmatprep.mubr.msk.f32.mxu1 %vm3550_vm0, %v3549_v3 }
 0x893   :  { %3026 = vmatpush3.msra.mxu0 %v3725_v56  ;;  %3032 = vmatprep.subr.mxu1 %v3549_v3 }
 0x894   :  { %3027 = vmatprep.subr.mxu0 %v3549_v3  ;;  %3029 = vmatprep.mubr.msk.f32.mxu0 %vm3550_vm0, %v3549_v3 }
 0x895   :  { %3028 = vmatpush3.msra.mxu0 %v3730_v57 }
 0x896   :  { %3043 = vmatprep.subr.mxu0 %v3549_v3 }
 0x944   :  { %v1010_v37 = vpop.f32.mrf.mxu0 }
 0x946   :  { %v2987_v38 = vpop.f32.mrf.mxu0 }
 0x94b   :  { %v1086_v39 = vpop.f32.mrf.mxu1 }
 0x94c   :  { %v1087_v40 = vadd.f32 %v1086_v39, %v1010_v37  ;;  %v1181_v41 = vpop.f32.mrf.mxu0 }
 0x94d   :  { %v1186_v42 = vrot.slane %v1181_v41, 2  ;;  %v2998_v43 = vpop.f32.mrf.mxu1 }
 0x94e   :  { %v1090_v44 = vadd.f32 %v3762_v63, %v1087_v40  ;;  %v3009_v45 = vpop.f32.mrf.mxu0 }
 0x94f   :  { %v1188_v46 = vadd.f32 %v1186_v42, %v3692_v35 }
 0x950   :  { %3266 = vtanh.f32 %v1090_v44  ;;  %v2718_v55 = vmul.f32 -1.442695, %v1090_v44 }
 0x951   :  { %3268 = vtanh.f32 %v1188_v46  ;;  %v2720_v58 = vmul.f32 -1.442695, %v1188_v46 }
 0x952   :  { %3270 = vpow2.f32 %v2718_v55 }
 0x953   :  { %3272 = vpow2.f32 %v2720_v58 }
 0x95d   :  { %v3267_v47 = vpop.eup %3266 }
 0x95e   :  { %v3269_v48 = vpop.eup %3268  ;;  %1100 = vrot.lane.b32.xlu1 %v3267_v47, %s3551_s20 }
 0x95f   :  { %1201 = vrot.lane.b32.xlu0 %v3269_v48, %s3551_s20  ;;  %v3271_v59 = vpop.eup %3270 }
 0x960   :  { %v3273_v60 = vpop.eup %3272  ;;  %v1094_v61 = vadd.f32 1.0, %v3271_v59 }
 0x961   :  { %v1192_v62 = vadd.f32 1.0, %v3273_v60 }
 0x962   :  { %3274 = vrcp.f32 %v1094_v61 }
 0x963   :  { %3276 = vrcp.f32 %v1192_v62 }
 0x96f   :  { %v3275_v0 = vpop.eup %3274 }
 0x970   :  { %v3277_v1 = vpop.eup %3276  ;;  %v1098_v7 = vmul.f32 %v3275_v0, %v3821_v17 }
 0x971   :  { %v1199_v8 = vmul.f32 %v3277_v1, %v1197_v6 }
 0x9d0   :  { %v1101_v35 = vpop.permute.xlu1 %1100 }
 0x9d1   :  { %v1202_v2 = vpop.permute.xlu0 %1201  ;;  %v1103_v4 = vmul.f32 %v3275_v0, %v1101_v35 }
 0x9d2   :  { %v1204_v5 = vmul.f32 %v3277_v1, %v1202_v2 }
 0x9d3   :  { %1105 = vrot.lane.b32.xlu1 %v1103_v4, %s3543_s4 }
 0x9d4   :  { %1206 = vrot.lane.b32.xlu0 %v1204_v5, %s3543_s4 }
 0xa45   :  { %v1106_v9 = vpop.permute.xlu1 %1105 }
 0xa46   :  { %v1207_v10 = vpop.permute.xlu0 %1206  ;;  %v3873_v11 = vadd.f32 %v1106_v9, %v1098_v7 }
 0xa47   :  { %v3875_v12 = vadd.f32 %v1207_v10, %v1199_v8 }
 0xa48   :  { %3278 = vtanh.f32 %v3873_v11 }
 0xa49   :  { %3280 = vtanh.f32 %v3875_v12  ;;  %v1471_v60 = vrot.slane %v3875_v12, 6 }
 0xa55   :  { %v3279_v13 = vpop.eup %3278 }
 0xa56   :  { %v3281_v14 = vpop.eup %3280  ;;  %1111 = vrot.lane.b32.xlu1 %v3279_v13, %s3551_s20 }
 0xa57   :  { %1212 = vrot.lane.b32.xlu0 %v3281_v14, %s3551_s20 }
 0xac8   :  { %v1112_v15 = vpop.permute.xlu1 %1111 }
 0xac9   :  { %v1213_v16 = vpop.permute.xlu0 %1212  ;;  %v1114_v17 = vmul.f32 %v3275_v0, %v1112_v15 }
 0xaca   :  { %v1215_v18 = vmul.f32 %v3277_v1, %v1213_v16 }
 0xacb   :  { %1217 = vrot.lane.b32.xlu0 %v1114_v17, %s3543_s4 }
 0xacc   :  { %v1292_v19 = vrot.slane %v1215_v18, 6 }
 0xace   :  { %1293 = vrot.lane.b32.xlu1 %v1292_v19, %s3543_s4 }
 0xb3d   :  { %v1218_v21 = vpop.permute.xlu0 %1217 }
 0xb3e   :  { %3019 = vmatmul.mubr.msk.f32.vlgmr.msra.gmra.mxu1 %vm286_vm2, %v1218_v21 }
 0xb3f   :  { %3033 = vmatpush3.msra.mxu1 %v3657_v20  ;;  %3040 = vmatprep.mubr.msk.f32.mxu1 %vm3550_vm0, %v3549_v3 }
 0xb40   :  { %3034 = vmatprep.subr.mxu1 %v3549_v3  ;;  %v1294_v22 = vpop.permute.xlu1 %1293 }
 0xb41   :  { %3030 = vmatmul.mubr.msk.f32.vlgmr.msra.gmra.mxu0 %vm286_vm2, %v1294_v22  ;;  %3035 = vmatpush3.msra.mxu1 %v3661_v25 }
 0xb42   :  { %3036 = vmatprep.subr.mxu1 %v3549_v3  ;;  %3044 = vmatpush3.msra.mxu0 %v3700_v49 }
 0xb43   :  { %3037 = vmatpush3.msra.mxu1 %v3665_v28  ;;  %3045 = vmatprep.subr.mxu0 %v3549_v3 }
 0xb44   :  { %3038 = vmatprep.subr.mxu1 %v3549_v3  ;;  %3046 = vmatpush3.msra.mxu0 %v3702_v50 }
 0xb45   :  { %3039 = vmatpush3.msra.mxu1 %v3669_v30  ;;  %3047 = vmatprep.subr.mxu0 %v3549_v3 }
 0xb46   :  { %3041 = vmatmul.mubr.msk.f32.vlgmr.msra.gmra.mxu1 %vm286_vm2, %v1294_v22  ;;  %3054 = vmatprep.subr.mxu1 %v3549_v3 }
 0xb47   :  { %3048 = vmatpush3.msra.mxu0 %v3706_v51  ;;  %3055 = vmatpush3.msra.mxu1 %v3714_v53 }
 0xb48   :  { %3049 = vmatprep.subr.mxu0 %v3549_v3  ;;  %3056 = vmatprep.subr.mxu1 %v3549_v3 }
 0xb49   :  { %3050 = vmatpush3.msra.mxu0 %v3710_v52  ;;  %3057 = vmatpush3.msra.mxu1 %v3719_v54 }
 0xb4a   :  { %3051 = vmatprep.mubr.msk.f32.mxu0 %vm3550_vm0, %v3549_v3  ;;  %3058 = vmatprep.subr.mxu1 %v3549_v3 }
 0xb4b   :  { %3065 = vmatprep.subr.mxu0 %v3549_v3  ;;  %3059 = vmatpush3.msra.mxu1 %v3725_v56 }
 0xb4c   :  { %3060 = vmatprep.subr.mxu1 %v3549_v3  ;;  %3062 = vmatprep.mubr.msk.f32.mxu1 %vm3550_vm0, %v3549_v3 }
 0xb4d   :  { %3061 = vmatpush3.msra.mxu1 %v3730_v57 }
 0xb4e   :  { %3076 = vmatprep.subr.mxu1 %v3549_v3 }
 0xbfe   :  { %v1287_v23 = vpop.f32.mrf.mxu1 }
 0xc00   :  { %v3020_v24 = vpop.f32.mrf.mxu1 }
 0xc01   :  { %v1363_v26 = vpop.f32.mrf.mxu0 }
 0xc02   :  { %v1364_v27 = vadd.f32 %v1363_v26, %v1287_v23 }
 0xc03   :  { %v3031_v29 = vpop.f32.mrf.mxu0 }
 0xc04   :  { %v1367_v31 = vadd.f32 %v3762_v63, %v1364_v27 }
 0xc06   :  { %3282 = vtanh.f32 %v1367_v31  ;;  %v1458_v32 = vpop.f32.mrf.mxu1  ;;  %v2723_v39 = vmul.f32 -1.442695, %v1367_v31 }
 0xc07   :  { %v1462_v34 = vadd.f32 %v1458_v32, %v3690_v33 }
 0xc08   :  { %v3042_v36 = vpop.f32.mrf.mxu1 }
 0xc09   :  { %3284 = vtanh.f32 %v1462_v34  ;;  %v2725_v40 = vmul.f32 -1.442695, %v1462_v34 }
 0xc0a   :  { %3286 = vpow2.f32 %v2723_v39 }
 0xc0b   :  { %3288 = vpow2.f32 %v2725_v40 }
 0xc13   :  { %v3283_v37 = vpop.eup %3282 }
 0xc14   :  { %1377 = vrot.lane.b32.xlu0 %v3283_v37, %s3551_s20 }
 0xc16   :  { %v3285_v38 = vpop.eup %3284 }
 0xc17   :  { %1475 = vrot.lane.b32.xlu1 %v3285_v38, %s3551_s20  ;;  %v3287_v41 = vpop.eup %3286 }
 0xc18   :  { %v3289_v42 = vpop.eup %3288  ;;  %v1371_v43 = vadd.f32 1.0, %v3287_v41 }
 0xc19   :  { %v1466_v44 = vadd.f32 1.0, %v3289_v42 }
 0xc1a   :  { %3290 = vrcp.f32 %v1371_v43 }
 0xc1b   :  { %3292 = vrcp.f32 %v1466_v44 }
 0xc27   :  { %v3291_v45 = vpop.eup %3290 }
 0xc28   :  { %v3293_v48 = vpop.eup %3292  ;;  %v1375_v59 = vmul.f32 %v3291_v45, %v3873_v11 }
 0xc29   :  { %v1473_v0 = vmul.f32 %v3293_v48, %v1471_v60 }
 0xc86   :  { %v1378_v46 = vpop.permute.xlu0 %1377 }
 0xc87   :  { %v1380_v47 = vmul.f32 %v3291_v45, %v1378_v46 }
 0xc89   :  { %1382 = vrot.lane.b32.xlu0 %v1380_v47, %s3543_s4  ;;  %v1476_v55 = vpop.permute.xlu1 %1475 }
 0xc8a   :  { %v1478_v58 = vmul.f32 %v3293_v48, %v1476_v55 }
 0xc8c   :  { %1480 = vrot.lane.b32.xlu1 %v1478_v58, %s3543_s4 }
 0xcfb   :  { %v1383_v61 = vpop.permute.xlu0 %1382 }
 0xcfc   :  { %v3924_v62 = vadd.f32 %v1383_v61, %v1375_v59 }
 0xcfe   :  { %3294 = vtanh.f32 %v3924_v62  ;;  %v1481_v35 = vpop.permute.xlu1 %1480 }
 0xcff   :  { %v3927_v1 = vadd.f32 %v1481_v35, %v1473_v0  ;;  %v3986_v0 = vld [vmem:[#allocation7 + $0x18] sm:$0xff] }
 0xd01   :  { %3296 = vtanh.f32 %v3927_v1  ;;  %v1747_v43 = vrot.slane %v3927_v1, 6 }
 0xd0b   :  { %v3295_v2 = vpop.eup %3294 }
 0xd0c   :  { %1388 = vrot.lane.b32.xlu0 %v3295_v2, %s3551_s20 }
 0xd0e   :  { %v3297_v4 = vpop.eup %3296 }
 0xd0f   :  { %1486 = vrot.lane.b32.xlu1 %v3297_v4, %s3551_s20 }
 0xd7e   :  { %v1389_v5 = vpop.permute.xlu0 %1388 }
 0xd7f   :  { %v1391_v6 = vmul.f32 %v3291_v45, %v1389_v5 }
 0xd81   :  { %1491 = vrot.lane.b32.xlu0 %v1391_v6, %s3543_s4  ;;  %v1487_v7 = vpop.permute.xlu1 %1486 }
 0xd82   :  { %v1489_v8 = vmul.f32 %v3293_v48, %v1487_v7 }
 0xd84   :  { %1566 = vrot.lane.b32.xlu1 %v1489_v8, %s3543_s4 }
 0xdf3   :  { %v1492_v9 = vpop.permute.xlu0 %1491 }
 0xdf4   :  { %3052 = vmatmul.mubr.msk.f32.vlgmr.msra.gmra.mxu0 %vm286_vm2, %v1492_v9 }
 0xdf5   :  { %3066 = vmatpush3.msra.mxu0 %v3657_v20  ;;  %3073 = vmatprep.mubr.msk.f32.mxu0 %vm3550_vm0, %v3549_v3 }
 0xdf6   :  { %3067 = vmatprep.subr.mxu0 %v3549_v3  ;;  %v1567_v10 = vpop.permute.xlu1 %1566 }
 0xdf7   :  { %3068 = vmatpush3.msra.mxu0 %v3661_v25  ;;  %3063 = vmatmul.mubr.msk.f32.vlgmr.msra.gmra.mxu1 %vm286_vm2, %v1567_v10 }
 0xdf8   :  { %3069 = vmatprep.subr.mxu0 %v3549_v3  ;;  %3077 = vmatpush3.msra.mxu1 %v3700_v49 }
 0xdf9   :  { %3070 = vmatpush3.msra.mxu0 %v3665_v28  ;;  %3078 = vmatprep.subr.mxu1 %v3549_v3 }
 0xdfa   :  { %3071 = vmatprep.subr.mxu0 %v3549_v3  ;;  %3079 = vmatpush3.msra.mxu1 %v3702_v50 }
 0xdfb   :  { %3072 = vmatpush3.msra.mxu0 %v3669_v30  ;;  %3080 = vmatprep.subr.mxu1 %v3549_v3 }
 0xdfc   :  { %3074 = vmatmul.mubr.msk.f32.vlgmr.msra.gmra.mxu0 %vm286_vm2, %v1567_v10  ;;  %3081 = vmatpush3.msra.mxu1 %v3706_v51 }
 0xdfd   :  { %3082 = vmatprep.subr.mxu1 %v3549_v3  ;;  %3087 = vmatprep.subr.mxu0 %v3549_v3 }
 0xdfe   :  { %3083 = vmatpush3.msra.mxu1 %v3710_v52  ;;  %3084 = vmatprep.mubr.msk.f32.mxu1 %vm3550_vm0, %v3549_v3 }
 0xdff   :  { %3088 = vmatpush3.msra.mxu0 %v3714_v53  ;;  %3098 = vmatprep.subr.mxu1 %v3549_v3 }
 0xe00   :  { %3089 = vmatprep.subr.mxu0 %v3549_v3  ;;  %3095 = vmatprep.mubr.msk.f32.mxu0 %vm3550_vm0, %v3549_v3 }
 0xe01   :  { %3090 = vmatpush3.msra.mxu0 %v3719_v54 }
 0xe02   :  { %3091 = vmatprep.subr.mxu0 %v3549_v3 }
 0xe03   :  { %3092 = vmatpush3.msra.mxu0 %v3725_v56 }
 0xe04   :  { %3093 = vmatprep.subr.mxu0 %v3549_v3 }
 0xe05   :  { %3094 = vmatpush3.msra.mxu0 %v3730_v57 }
 0xe06   :  { %3109 = vmatprep.subr.mxu0 %v3549_v3 }
 0xeb4   :  { %v1561_v20 = vpop.f32.mrf.mxu0 }
 0xeb6   :  { %v3053_v11 = vpop.f32.mrf.mxu0 }
 0xeb7   :  { %v1636_v12 = vpop.f32.mrf.mxu1 }
 0xeb8   :  { %v1637_v13 = vadd.f32 %v1636_v12, %v1561_v20 }
 0xeb9   :  { %v3064_v14 = vpop.f32.mrf.mxu1 }
 0xeba   :  { %v1640_v15 = vadd.f32 %v3762_v63, %v1637_v13 }
 0xebc   :  { %3298 = vtanh.f32 %v1640_v15  ;;  %v1731_v16 = vpop.f32.mrf.mxu0  ;;  %v2728_v23 = vmul.f32 -1.442695, %v1640_v15 }
 0xebd   :  { %v1736_v17 = vrot.slane %v1731_v16, 6 }
 0xebe   :  { %v3075_v18 = vpop.f32.mrf.mxu0 }
 0xebf   :  { %v1738_v19 = vadd.f32 %v1736_v17, %v3690_v33 }
 0xec1   :  { %3300 = vtanh.f32 %v1738_v19  ;;  %v2730_v24 = vmul.f32 -1.442695, %v1738_v19 }
 0xec2   :  { %3302 = vpow2.f32 %v2728_v23 }
 0xec3   :  { %3304 = vpow2.f32 %v2730_v24 }
 0xec9   :  { %v3299_v21 = vpop.eup %3298 }
 0xeca   :  { %1650 = vrot.lane.b32.xlu0 %v3299_v21, %s3551_s20 }
 0xece   :  { %v3301_v22 = vpop.eup %3300 }
 0xecf   :  { %1751 = vrot.lane.b32.xlu1 %v3301_v22, %s3551_s20  ;;  %v3303_v26 = vpop.eup %3302 }
 0xed0   :  { %v1644_v27 = vadd.f32 1.0, %v3303_v26  ;;  %v3305_v29 = vpop.eup %3304 }
 0xed1   :  { %v1742_v31 = vadd.f32 1.0, %v3305_v29 }
 0xed2   :  { %3306 = vrcp.f32 %v1644_v27 }
 0xed3   :  { %3308 = vrcp.f32 %v1742_v31 }
 0xedf   :  { %v3307_v32 = vpop.eup %3306 }
 0xee0   :  { %v3309_v37 = vpop.eup %3308  ;;  %v1648_v40 = vmul.f32 %v3307_v32, %v3924_v62 }
 0xee1   :  { %v1749_v44 = vmul.f32 %v3309_v37, %v1747_v43  ;;  %v3363_v43 = vld [vmem:[#allocation8 + $0x10] sm:$0xff] }
 0xf3c   :  { %v1651_v34 = vpop.permute.xlu0 %1650 }
 0xf3d   :  { %v1653_v36 = vmul.f32 %v3307_v32, %v1651_v34  ;;  %v3355_v34 = vld [vmem:[#allocation7 + $0x10] sm:$0xff] }
 0xf3f   :  { %1655 = vrot.lane.b32.xlu0 %v1653_v36, %s3543_s4  ;;  %v3356_v36 = vld [vmem:[#allocation10 + $0x18] sm:$0xff] }
 0xf41   :  { %v1752_v38 = vpop.permute.xlu1 %1751 }
 0xf42   :  { %v1754_v39 = vmul.f32 %v3309_v37, %v1752_v38  ;;  %v3358_v38 = vld [vmem:[#allocation10 + $0x10] sm:$0xff] }
 0xf44   :  { %1756 = vrot.lane.b32.xlu1 %v1754_v39, %s3543_s4  ;;  %v3359_v39 = vld [vmem:[#allocation7] sm:$0xff] }
 0xfb1   :  { %v1656_v41 = vpop.permute.xlu0 %1655 }
 0xfb2   :  { %v3974_v42 = vadd.f32 %v1656_v41, %v1648_v40  ;;  %v3360_v40 = vld [vmem:[#allocation10 + $0x8] sm:$0xff]  ;;  %v3361_v41 = vld [vmem:[#allocation10] sm:$0xff] }
 0xfb4   :  { %3310 = vtanh.f32 %v3974_v42 }
 0xfb6   :  { %v1757_v45 = vpop.permute.xlu1 %1756 }
 0xfb7   :  { %v3978_v46 = vadd.f32 %v1757_v45, %v1749_v44  ;;  %v3364_v44 = vld [vmem:[#allocation8 + $0x8] sm:$0xff]  ;;  %v3365_v45 = vld [vmem:[#allocation8] sm:$0xff] }
 0xfb9   :  { %3312 = vtanh.f32 %v3978_v46  ;;  %v2024_v13 = vrot.slane %v3978_v46, 6 }
 0xfc1   :  { %v3311_v47 = vpop.eup %3310 }
 0xfc2   :  { %1661 = vrot.lane.b32.xlu0 %v3311_v47, %s3551_s20 }
 0xfc6   :  { %v3313_v48 = vpop.eup %3312 }
 0xfc7   :  { %1762 = vrot.lane.b32.xlu1 %v3313_v48, %s3551_s20 }
0x1034   :  { %v1662_v55 = vpop.permute.xlu0 %1661 }
0x1035   :  { %v1664_v58 = vmul.f32 %v3307_v32, %v1662_v55 }
0x1037   :  { %1767 = vrot.lane.b32.xlu0 %v1664_v58, %s3543_s4 }
0x1039   :  { %v1763_v59 = vpop.permute.xlu1 %1762 }
0x103a   :  { %v1765_v60 = vmul.f32 %v3309_v37, %v1763_v59  ;;  %v3357_v37 = vld [vmem:[#allocation7 + $0x8] sm:$0xff]  ;;  %v3366_v59 = vld [vmem:[%s4125_s6] ss:$0 sm:$0xff] }
0x103c   :  { %v1842_v61 = vrot.slane %v1765_v60, 2 }
0x103e   :  { %1843 = vrot.lane.b32.xlu1 %v1842_v61, %s3543_s4 }
0x10a9   :  { %v1768_v62 = vpop.permute.xlu0 %1767 }
0x10aa   :  { %3085 = vmatmul.mubr.msk.f32.vlgmr.msra.gmra.mxu1 %vm286_vm2, %v1768_v62 }
0x10ab   :  { %3099 = vmatpush3.msra.mxu1 %v3986_v0  ;;  %3106 = vmatprep.mubr.msk.f32.mxu1 %vm3550_vm0, %v3549_v3 }
0x10ac   :  { %3100 = vmatprep.subr.mxu1 %v3549_v3 }
0x10ad   :  { %3101 = vmatpush3.msra.mxu1 %v3661_v25 }
0x10ae   :  { %3102 = vmatprep.subr.mxu1 %v3549_v3 }
0x10af   :  { %3103 = vmatpush3.msra.mxu1 %v3665_v28 }
0x10b0   :  { %v1844_v35 = vpop.permute.xlu1 %1843  ;;  %3104 = vmatprep.subr.mxu1 %v3549_v3 }
0x10b1   :  { %3096 = vmatmul.mubr.msk.f32.vlgmr.msra.gmra.mxu0 %vm286_vm2, %v1844_v35  ;;  %3105 = vmatpush3.msra.mxu1 %v3669_v30 }
0x10b2   :  { %3107 = vmatmul.mubr.msk.f32.vlgmr.msra.gmra.mxu1 %vm286_vm2, %v1844_v35  ;;  %3110 = vmatpush3.msra.mxu0 %v3700_v49 }
0x10b3   :  { %3111 = vmatprep.subr.mxu0 %v3549_v3  ;;  %3120 = vmatprep.subr.mxu1 %v3549_v3 }
0x10b4   :  { %3112 = vmatpush3.msra.mxu0 %v3702_v50  ;;  %3121 = vmatpush3.msra.mxu1 %v3714_v53 }
0x10b5   :  { %3113 = vmatprep.subr.mxu0 %v3549_v3  ;;  %3122 = vmatprep.subr.mxu1 %v3549_v3 }
0x10b6   :  { %3114 = vmatpush3.msra.mxu0 %v3706_v51  ;;  %3123 = vmatpush3.msra.mxu1 %v3719_v54 }
0x10b7   :  { %3115 = vmatprep.subr.mxu0 %v3549_v3  ;;  %3117 = vmatprep.mubr.msk.f32.mxu0 %vm3550_vm0, %v3549_v3 }
0x10b8   :  { %3116 = vmatpush3.msra.mxu0 %v3710_v52  ;;  %3124 = vmatprep.subr.mxu1 %v3549_v3 }
0x10b9   :  { %3131 = vmatprep.subr.mxu0 %v3549_v3  ;;  %3125 = vmatpush3.msra.mxu1 %v3725_v56 }
0x10ba   :  { %3126 = vmatprep.subr.mxu1 %v3549_v3  ;;  %3128 = vmatprep.mubr.msk.f32.mxu1 %vm3550_vm0, %v3549_v3 }
0x10bb   :  { %3127 = vmatpush3.msra.mxu1 %v3730_v57 }
0x10bc   :  { %3142 = vmatprep.subr.mxu1 %v3549_v3 }
0x116a   :  { %v1837_v25 = vpop.f32.mrf.mxu1 }
0x116c   :  { %v3086_v28 = vpop.f32.mrf.mxu1 }
0x1171   :  { %v1913_v30 = vpop.f32.mrf.mxu0 }
0x1172   :  { %v1914_v49 = vadd.f32 %v1913_v30, %v1837_v25  ;;  %v2008_v50 = vpop.f32.mrf.mxu1 }
0x1173   :  { %v2013_v51 = vrot.slane %v2008_v50, 4  ;;  %v3097_v52 = vpop.f32.mrf.mxu0 }
0x1174   :  { %v1917_v53 = vadd.f32 %v3762_v63, %v1914_v49  ;;  %v3108_v54 = vpop.f32.mrf.mxu1 }
0x1175   :  { %v2015_v56 = vadd.f32 %v2013_v51, %v3690_v33 }
0x1176   :  { %3314 = vtanh.f32 %v1917_v53  ;;  %v2733_v57 = vmul.f32 -1.442695, %v1917_v53 }
0x1177   :  { %3316 = vtanh.f32 %v2015_v56  ;;  %v2735_v4 = vmul.f32 -1.442695, %v2015_v56 }
0x1178   :  { %3318 = vpow2.f32 %v2733_v57 }
0x1179   :  { %3320 = vpow2.f32 %v2735_v4 }
0x1183   :  { %v3315_v1 = vpop.eup %3314 }
0x1184   :  { %v3317_v2 = vpop.eup %3316  ;;  %1927 = vrot.lane.b32.xlu0 %v3315_v1, %s3551_s20 }
0x1185   :  { %2028 = vrot.lane.b32.xlu1 %v3317_v2, %s3551_s20  ;;  %v3319_v5 = vpop.eup %3318 }
0x1186   :  { %v3321_v6 = vpop.eup %3320  ;;  %v1921_v7 = vadd.f32 1.0, %v3319_v5 }
0x1187   :  { %v2019_v8 = vadd.f32 1.0, %v3321_v6 }
0x1188   :  { %3322 = vrcp.f32 %v1921_v7 }
0x1189   :  { %3324 = vrcp.f32 %v2019_v8 }
0x1195   :  { %v3323_v63 = vpop.eup %3322 }
0x1196   :  { %v3325_v10 = vpop.eup %3324  ;;  %v1925_v14 = vmul.f32 %v3323_v63, %v3974_v42  ;;  %v3362_v42 = vld [vmem:[#allocation8 + $0x18] sm:$0xff] }
0x1197   :  { %v2026_v16 = vmul.f32 %v3325_v10, %v2024_v13 }
0x11f6   :  { %v1928_v9 = vpop.permute.xlu0 %1927 }
0x11f7   :  { %v1930_v20 = vmul.f32 %v3323_v63, %v1928_v9  ;;  %v2029_v11 = vpop.permute.xlu1 %2028 }
0x11f8   :  { %v2031_v12 = vmul.f32 %v3325_v10, %v2029_v11 }
0x11f9   :  { %1932 = vrot.lane.b32.xlu0 %v1930_v20, %s3543_s4 }
0x11fa   :  { %2033 = vrot.lane.b32.xlu1 %v2031_v12, %s3543_s4 }
0x126b   :  { %v1933_v15 = vpop.permute.xlu0 %1932 }
0x126c   :  { %v4028_v17 = vadd.f32 %v1933_v15, %v1925_v14  ;;  %v2034_v18 = vpop.permute.xlu1 %2033 }
0x126d   :  { %v4030_v19 = vadd.f32 %v2034_v18, %v2026_v16 }
0x126e   :  { %3326 = vtanh.f32 %v4028_v17 }
0x126f   :  { %3328 = vtanh.f32 %v4030_v19  ;;  %v2301_v7 = vrot.slane %v4030_v19, 6 }
0x127b   :  { %v3327_v21 = vpop.eup %3326 }
0x127c   :  { %v3329_v22 = vpop.eup %3328  ;;  %1938 = vrot.lane.b32.xlu0 %v3327_v21, %s3551_s20 }
0x127d   :  { %2039 = vrot.lane.b32.xlu1 %v3329_v22, %s3551_s20 }
0x12ee   :  { %v1939_v23 = vpop.permute.xlu0 %1938 }
0x12ef   :  { %v1941_v24 = vmul.f32 %v3323_v63, %v1939_v23  ;;  %v2040_v26 = vpop.permute.xlu1 %2039 }
0x12f0   :  { %v2042_v27 = vmul.f32 %v3325_v10, %v2040_v26 }
0x12f1   :  { %2044 = vrot.lane.b32.xlu0 %v1941_v24, %s3543_s4 }
0x12f2   :  { %v2119_v29 = vrot.slane %v2042_v27, 4 }
0x12f4   :  { %2120 = vrot.lane.b32.xlu1 %v2119_v29, %s3543_s4 }
0x1363   :  { %v2045_v31 = vpop.permute.xlu0 %2044 }
0x1364   :  { %3118 = vmatmul.mubr.msk.f32.vlgmr.msra.gmra.mxu0 %vm286_vm2, %v2045_v31 }
0x1365   :  { %3132 = vmatpush3.msra.mxu0 %v3986_v0  ;;  %3139 = vmatprep.mubr.msk.f32.mxu0 %vm3550_vm0, %v3549_v3 }
0x1366   :  { %3133 = vmatprep.subr.mxu0 %v3549_v3  ;;  %v2121_v32 = vpop.permute.xlu1 %2120 }
0x1367   :  { %3134 = vmatpush3.msra.mxu0 %v3355_v34  ;;  %3129 = vmatmul.mubr.msk.f32.vlgmr.msra.gmra.mxu1 %vm286_vm2, %v2121_v32 }
0x1368   :  { %3135 = vmatprep.subr.mxu0 %v3549_v3  ;;  %3143 = vmatpush3.msra.mxu1 %v3356_v36 }
0x1369   :  { %3136 = vmatpush3.msra.mxu0 %v3357_v37  ;;  %3144 = vmatprep.subr.mxu1 %v3549_v3 }
0x136a   :  { %3137 = vmatprep.subr.mxu0 %v3549_v3  ;;  %3145 = vmatpush3.msra.mxu1 %v3358_v38 }
0x136b   :  { %3138 = vmatpush3.msra.mxu0 %v3359_v39  ;;  %3146 = vmatprep.subr.mxu1 %v3549_v3 }
0x136c   :  { %3140 = vmatmul.mubr.msk.f32.vlgmr.msra.gmra.mxu0 %vm286_vm2, %v2121_v32  ;;  %3147 = vmatpush3.msra.mxu1 %v3360_v40  ;;  %v2506_v40 = vld [vmem:[#allocation11 + $0x18] sm:$0xff] }
0x136d   :  { %3148 = vmatprep.subr.mxu1 %v3549_v3  ;;  %3153 = vmatprep.subr.mxu0 %v3549_v3 }
0x136e   :  { %3149 = vmatpush3.msra.mxu1 %v3361_v41  ;;  %3150 = vmatprep.mubr.msk.f32.mxu1 %vm3550_vm0, %v3549_v3  ;;  %v2505_v41 = vld [vmem:[#allocation11 + $0x10] sm:$0xff] }
0x136f   :  { %3154 = vmatpush3.msra.mxu0 %v3362_v42  ;;  %3161 = vmatprep.mubr.msk.f32.mxu0 %vm3550_vm0, %v3549_v3  ;;  %v2504_v42 = vld [vmem:[#allocation11 + $0x8] sm:$0xff] }
0x1370   :  { %3155 = vmatprep.subr.mxu0 %v3549_v3  ;;  %3164 = vmatprep.subr.mxu1 %v3549_v3 }
0x1371   :  { %3156 = vmatpush3.msra.mxu0 %v3363_v43  ;;  %v2503_v43 = vld [vmem:[#allocation11] sm:$0xff] }
0x1372   :  { %3157 = vmatprep.subr.mxu0 %v3549_v3 }
0x1373   :  { %3158 = vmatpush3.msra.mxu0 %v3364_v44 }
0x1374   :  { %3159 = vmatprep.subr.mxu0 %v3549_v3 }
0x1375   :  { %3160 = vmatpush3.msra.mxu0 %v3365_v45  ;;  %v2605_v45 = vld [vmem:[#allocation13 + $0x78] sm:$0xff] }
0x1376   :  { %3175 = vmatprep.subr.mxu0 %v3549_v3 }
0x1424   :  { %v2114_v46 = vpop.f32.mrf.mxu0 }
0x1426   :  { %v3119_v47 = vpop.f32.mrf.mxu0 }
0x1427   :  { %v2190_v48 = vpop.f32.mrf.mxu1  ;;  %v2603_v47 = vld [vmem:[#allocation13 + $0x68] sm:$0xff] }
0x1428   :  { %v2191_v55 = vadd.f32 %v2190_v48, %v2114_v46  ;;  %v2604_v46 = vld [vmem:[#allocation13 + $0x70] sm:$0xff]  ;;  %v2602_v48 = vld [vmem:[#allocation13 + $0x60] sm:$0xff] }
0x1429   :  { %v3130_v58 = vpop.f32.mrf.mxu1 }
0x142a   :  { %v2194_v60 = vadd.f32 %v3366_v59, %v2191_v55 }
0x142c   :  { %3330 = vtanh.f32 %v2194_v60  ;;  %v2285_v61 = vpop.f32.mrf.mxu0  ;;  %v2738_v30 = vmul.f32 -1.442695, %v2194_v60 }
0x142d   :  { %v2290_v62 = vrot.slane %v2285_v61, 2  ;;  %v2600_v61 = vld [vmem:[#allocation13 + $0x50] sm:$0xff] }
0x142e   :  { %v3141_v0 = vpop.f32.mrf.mxu0 }
0x142f   :  { %v2292_v35 = vadd.f32 %v2290_v62, %v3690_v33  ;;  %v2599_v0 = vld [vmem:[#allocation13 + $0x48] sm:$0xff] }
0x1431   :  { %3332 = vtanh.f32 %v2292_v35  ;;  %v2740_v49 = vmul.f32 -1.442695, %v2292_v35 }
0x1432   :  { %3334 = vpow2.f32 %v2738_v30  ;;  %v2596_v30 = vld [vmem:[#allocation13 + $0x30] sm:$0xff] }
0x1433   :  { %3336 = vpow2.f32 %v2740_v49  ;;  %v2595_v49 = vld [vmem:[#allocation13 + $0x28] sm:$0xff] }
0x1439   :  { %v3331_v25 = vpop.eup %3330 }
0x143a   :  { %2204 = vrot.lane.b32.xlu1 %v3331_v25, %s3551_s20  ;;  %v2598_v25 = vld [vmem:[#allocation13 + $0x40] sm:$0xff] }
0x143e   :  { %v3333_v28 = vpop.eup %3332 }
0x143f   :  { %2305 = vrot.lane.b32.xlu0 %v3333_v28, %s3551_s20  ;;  %v3335_v50 = vpop.eup %3334  ;;  %v2597_v28 = vld [vmem:[#allocation13 + $0x38] sm:$0xff] }
0x1440   :  { %v2198_v51 = vadd.f32 1.0, %v3335_v50  ;;  %v3337_v52 = vpop.eup %3336  ;;  %v2594_v50 = vld [vmem:[#allocation13 + $0x20] sm:$0xff] }
0x1441   :  { %v2296_v53 = vadd.f32 1.0, %v3337_v52 }
0x1442   :  { %3338 = vrcp.f32 %v2198_v51  ;;  %v2593_v51 = vld [vmem:[#allocation13 + $0x18] sm:$0xff] }
0x1443   :  { %3340 = vrcp.f32 %v2296_v53  ;;  %v2592_v53 = vld [vmem:[#allocation13 + $0x10] sm:$0xff] }
0x144f   :  { %v3339_v54 = vpop.eup %3338 }
0x1450   :  { %v3341_v1 = vpop.eup %3340  ;;  %v2202_v4 = vmul.f32 %v3339_v54, %v4028_v17 }
0x1451   :  { %v2303_v8 = vmul.f32 %v3341_v1, %v2301_v7 }
0x14ac   :  { %v2205_v56 = vpop.permute.xlu1 %2204 }
0x14ad   :  { %v2207_v33 = vmul.f32 %v3339_v54, %v2205_v56  ;;  %v2590_v56 = vld [vmem:[#allocation13] sm:$0xff] }
0x14af   :  { %2209 = vrot.lane.b32.xlu1 %v2207_v33, %s3543_s4  ;;  %v2744_v33 = vld [vmem:[%s4127_s8] ss:$0 sm:$0xff] }
0x14b1   :  { %v2306_v2 = vpop.permute.xlu0 %2305 }
0x14b2   :  { %v2308_v57 = vmul.f32 %v3341_v1, %v2306_v2 }
0x14b4   :  { %2310 = vrot.lane.b32.xlu0 %v2308_v57, %s3543_s4 }
0x1521   :  { %v2210_v5 = vpop.permute.xlu1 %2209 }
0x1522   :  { %v2212_v6 = vadd.f32 %v2210_v5, %v2202_v4  ;;  %v2746_v5 = vld [vmem:[%s4129_s10] ss:$0 sm:$0xff] }
0x1524   :  { %3342 = vtanh.f32 %v2212_v6 }
0x1526   :  { %v2311_v63 = vpop.permute.xlu0 %2310 }
0x1527   :  { %v2313_v9 = vadd.f32 %v2311_v63, %v2303_v8 }
0x1529   :  { %3344 = vtanh.f32 %v2313_v9 }
0x1531   :  { %v3343_v10 = vpop.eup %3342 }
0x1532   :  { %2215 = vrot.lane.b32.xlu1 %v3343_v10, %s3551_s20 }
0x1536   :  { %v3345_v20 = vpop.eup %3344 }
0x1537   :  { %2316 = vrot.lane.b32.xlu0 %v3345_v20, %s3551_s20 }
0x15a4   :  { %v2216_v11 = vpop.permute.xlu1 %2215 }
0x15a5   :  { %v2218_v12 = vmul.f32 %v3339_v54, %v2216_v11  ;;  %v2591_v54 = vld [vmem:[#allocation13 + $0x8] sm:$0xff] }
0x15a7   :  { %2321 = vrot.lane.b32.xlu0 %v2218_v12, %s3543_s4 }
0x15a9   :  { %v2317_v13 = vpop.permute.xlu0 %2316 }
0x15aa   :  { %v4073_v14 = vmul.f32 %v3341_v1, %v2317_v13 }
0x15ac   :  { %v2396_v15 = vrot.slane %v4073_v14, 6 }
0x15ae   :  { %2397 = vrot.lane.b32.xlu1 %v2396_v15, %s3543_s4 }
0x1619   :  { %v2322_v16 = vpop.permute.xlu0 %2321 }
0x161a   :  { %3151 = vmatmul.mubr.msk.f32.vlgmr.msra.gmra.mxu1 %vm286_vm2, %v2322_v16 }
0x161b   :  { %3172 = vmatprep.mubr.msk.f32.mxu1 %vm3550_vm0, %v3549_v3  ;;  %3165 = vmatpush3.msra.mxu1 %v2506_v40 }
0x161c   :  { %3166 = vmatprep.subr.mxu1 %v3549_v3 }
0x161d   :  { %3167 = vmatpush3.msra.mxu1 %v2505_v41 }
0x161e   :  { %3168 = vmatprep.subr.mxu1 %v3549_v3 }
0x161f   :  { %3169 = vmatpush3.msra.mxu1 %v2504_v42 }
0x1620   :  { %v2398_v17 = vpop.permute.xlu1 %2397  ;;  %3170 = vmatprep.subr.mxu1 %v3549_v3 }
0x1621   :  { %3162 = vmatmul.mubr.msk.f32.vlgmr.msra.gmra.mxu0 %vm286_vm2, %v2398_v17  ;;  %3171 = vmatpush3.msra.mxu1 %v2503_v43 }
0x1622   :  { %3207 = vmatprep.mubr.msk.f32.mxu0 %vm3550_vm0, %v3549_v3  ;;  %3176 = vmatpush3.msra.mxu0 %v2605_v45 }
0x1623   :  { %3177 = vmatprep.subr.mxu0 %v3549_v3 }
0x1624   :  { %3178 = vmatpush3.msra.mxu0 %v2604_v46 }
0x1625   :  { %3179 = vmatprep.subr.mxu0 %v3549_v3 }
0x1626   :  { %3180 = vmatpush3.msra.mxu0 %v2603_v47 }
0x1627   :  { %3181 = vmatprep.subr.mxu0 %v3549_v3 }
0x1628   :  { %3182 = vmatpush3.msra.mxu0 %v2602_v48 }
0x1629   :  { %3183 = vmatprep.subr.mxu0 %v3549_v3 }
0x16da   :  { %v2391_v18 = vpop.f32.mrf.mxu1 }
0x16dc   :  { %v3152_v19 = vpop.f32.mrf.mxu1 }
0x16e1   :  { %v2467_v21 = vpop.f32.mrf.mxu0 }
0x16e2   :  { %v2468_v22 = vadd.f32 %v2467_v21, %v2391_v18 }
0x16e3   :  { %v3163_v23 = vpop.f32.mrf.mxu0 }
0x16e4   :  { %v2471_v24 = vadd.f32 %v3366_v59, %v2468_v22  ;;  %v2601_v59 = vld [vmem:[#allocation13 + $0x58] sm:$0xff] }
0x16e5   :  { %3184 = vmatpush3.msra.mxu0 %v2601_v59 }
0x16e6   :  { %3346 = vtanh.f32 %v2471_v24  ;;  %v2743_v27 = vmul.f32 -1.442695, %v2471_v24  ;;  %3185 = vmatprep.subr.mxu0 %v3549_v3 }
0x16e7   :  { %3186 = vmatpush3.msra.mxu0 %v2600_v61 }
0x16e8   :  { %3348 = vpow2.f32 %v2743_v27  ;;  %3187 = vmatprep.subr.mxu0 %v3549_v3 }
0x16e9   :  { %3188 = vmatpush3.msra.mxu0 %v2599_v0 }
0x16ea   :  { %3189 = vmatprep.subr.mxu0 %v3549_v3 }
0x16eb   :  { %3190 = vmatpush3.msra.mxu0 %v2598_v25 }
0x16ec   :  { %3191 = vmatprep.subr.mxu0 %v3549_v3 }
0x16ed   :  { %3192 = vmatpush3.msra.mxu0 %v2597_v28 }
0x16ee   :  { %3193 = vmatprep.subr.mxu0 %v3549_v3 }
0x16ef   :  { %3194 = vmatpush3.msra.mxu0 %v2596_v30 }
0x16f0   :  { %3195 = vmatprep.subr.mxu0 %v3549_v3 }
0x16f1   :  { %3196 = vmatpush3.msra.mxu0 %v2595_v49 }
0x16f2   :  { %3197 = vmatprep.subr.mxu0 %v3549_v3 }
0x16f3   :  { %v3347_v26 = vpop.eup %3346  ;;  %3198 = vmatpush3.msra.mxu0 %v2594_v50 }
0x16f4   :  { %2481 = vrot.lane.b32.xlu0 %v3347_v26, %s3551_s20  ;;  %3199 = vmatprep.subr.mxu0 %v3549_v3 }
0x16f5   :  { %v3349_v29 = vpop.eup %3348  ;;  %3200 = vmatpush3.msra.mxu0 %v2593_v51 }
0x16f6   :  { %v2475_v31 = vadd.f32 1.0, %v3349_v29  ;;  %3201 = vmatprep.subr.mxu0 %v3549_v3 }
0x16f7   :  { %3202 = vmatpush3.msra.mxu0 %v2592_v53 }
0x16f8   :  { %3350 = vrcp.f32 %v2475_v31  ;;  %3203 = vmatprep.subr.mxu0 %v3549_v3 }
0x16f9   :  { %3204 = vmatpush3.msra.mxu0 %v2591_v54 }
0x16fa   :  { %3205 = vmatprep.subr.mxu0 %v3549_v3 }
0x16fb   :  { %3206 = vmatpush3.msra.mxu0 %v2590_v56 }
0x1705   :  { %v3351_v32 = vpop.eup %3350 }
0x1706   :  { %v2479_v37 = vmul.f32 %v3351_v32, %v2212_v6 }
0x1766   :  { %v2482_v34 = vpop.permute.xlu0 %2481 }
0x1767   :  { %v2484_v36 = vmul.f32 %v3351_v32, %v2482_v34 }
0x1769   :  { %2486 = vrot.lane.b32.xlu1 %v2484_v36, %s3543_s4 }
0x17db   :  { %v2487_v38 = vpop.permute.xlu1 %2486 }
0x17dc   :  { %v2489_v39 = vadd.f32 %v2487_v38, %v2479_v37 }
0x17de   :  { %3352 = vtanh.f32 %v2489_v39 }
0x17eb   :  { %v3353_v44 = vpop.eup %3352 }
0x17ec   :  { %2492 = vrot.lane.b32.xlu0 %v3353_v44, %s3551_s20 }
0x185e   :  { %v2493_v55 = vpop.permute.xlu0 %2492 }
0x185f   :  { %v2495_v58 = vmul.f32 %v3351_v32, %v2493_v55 }
0x1861   :  { %v2498_v60 = vrot.slane %v2495_v58, 6 }
0x1863   :  { %v2501_v62 = vsel %vm2500_vm3, %v2396_v15, %v2498_v60 }
0x1864   :  { %v2502_v35 = vmax.f32 %v2501_v62, 0.0 }
0x1866   :  { %2515 = vrot.lane.b32.xlu1 %v2502_v35, %s3543_s4 }
0x18d8   :  { %v2516_v52 = vpop.permute.xlu1 %2515 }
0x18d9   :  { %3173 = vmatmul.mubr.msk.f32.vlgmr.msra.gmra.mxu1 %vm286_vm2, %v2516_v52 }
0x1999   :  { %v2585_v1 = vpop.f32.mrf.mxu1 }
0x199a   :  { %v2586_v2 = vadd.f32 %v2744_v33, %v2585_v1 }
0x199b   :  { %v3174_v57 = vpop.f32.mrf.mxu1 }
0x199c   :  { %v2589_v4 = vmax.f32 %v2586_v2, 0.0 }
0x199e   :  { %3208 = vmatmul.mubr.f32.vlgmr.msra.gmra.mxu0 %v2589_v4 }
0x1a5e   :  { %v2679_v6 = vpop.f32.mrf.mxu0 }
0x1a5f   :  { %v2680_v7 = vadd.f32 %v2746_v5, %v2679_v6 }
0x1a60   :  { %v3209_v3 = vpop.f32.mrf.mxu0 }
0x1a61   :  { %2683 = vst [vmem:[#allocation14] sm:$0xf] %v2680_v7 }
0x1a62   :  { %3518 = shalt.err (!%p3515_p11)
}
0x1a63   :  { %2693 = dma.vmem_to_hbm [thread:$0]  %s2691_s19, 64, %s4130_s11, [#allocation4]  }
0x1a64   :  { %3535 = dma.done.wait [#allocation4], 64  }
0x1a65   :  { %3536 = vsyncadd [#allocation4], 4294967232 }
0x1a66   :  { %2697 = vsyncpa [#allocation3], 1 }
0x1a67   :  { %2698 = vsyncpa [#allocation6], 1 }
0x1a68   :  { %2699 = vsyncpa [#allocation9], 1 }
0x1a69   :  { %2700 = vsyncpa [#allocation12], 1 }
0x1a6a   :  { %2701 = vsyncpa [#allocation4], 1 }

</bundles_post_ra>
